<compile_context>
chip_gen: v6e
topology: v6e:2x2x1
jax: 0.10.0
libtpu: 0.0.40
codegen_flags: <defaults>
</compile_context>

<pallas_src>
import functools

import numpy as np
import jax
import jax.numpy as jnp
from jax import lax
from jax.experimental import pallas as pl
from jax.experimental.pallas import tpu as pltpu

LN_EPS = 0.1
MIX_W = (3.0 / 20.0, 3.0 / 4.0, 1.0 / 10.0)
LOG_W = tuple(float(np.log(w)) for w in MIX_W)
LOG_2PI = float(np.log(2.0 * np.pi))
EXP_NEG_10 = float(np.exp(-10.0))
NORM_SQ_MIN = 1e-24  # clamp for ||x||^2 so zero / padded rows stay finite


def composite_prior_kernel(
    x_ref, z_ref,
    w1, b1, w2, b2, w3, b3, w4, b4, w5, b5,
    g1, be1, g2, be2, g3, be3, g4, be4, g5, be5,
    wheads, bheads,
    out_ref,
    *, hidden_dim, latent_p,
):
    x = x_ref[...]                      # f32 (tb, input_dim)
    z = z_ref[...].astype(jnp.float32)  # f32 (tb, latent_p)

    inv_h = 1.0 / float(hidden_dim)

    def dot_bf16(v, w_ref):
        # Cast operands to bf16 immediately before the dot (MXU-native on v6e/v7x);
        # accumulate in f32.  Elementwise math around it stays f32.
        return jnp.dot(v.astype(jnp.bfloat16), w_ref[...],
                       preferred_element_type=jnp.float32)

    def swish(v):
        return v * jax.nn.sigmoid(v)

    def layernorm(v, g_ref, b_ref):
        # One-pass variance: var = E[v^2] - mean^2.  Sums run over the (possibly padded)
        # lane width, but padded lanes are exactly zero, so dividing by the true
        # hidden_dim gives the exact un-padded statistics.
        mean = jnp.sum(v, axis=-1, keepdims=True) * inv_h
        meansq = jnp.sum(v * v, axis=-1, keepdims=True) * inv_h
        var = meansq - mean * mean
        return (v - mean) * lax.rsqrt(var + LN_EPS) * g_ref[...] + b_ref[...]

    # --- Encoder.forward (dropout_rate = 0) ---
    # Row L2 norm folded into the fc1 output: (s*x) @ W == s * (x @ W).
    sq = jnp.sum(x * x, axis=-1, keepdims=True)
    s = lax.rsqrt(jnp.maximum(sq, NORM_SQ_MIN))

    h1 = layernorm(swish(s * dot_bf16(x, w1) + b1[...]), g1, be1)
    h_sum = h1
    h2 = layernorm(swish(dot_bf16(h1, w2) + b2[...] + h_sum), g2, be2)
    h_sum = h_sum + h2
    h3 = layernorm(swish(dot_bf16(h2, w3) + b3[...] + h_sum), g3, be3)
    h_sum = h_sum + h3
    h4 = layernorm(swish(dot_bf16(h3, w4) + b4[...] + h_sum), g4, be4)
    h_sum = h_sum + h4
    h5 = layernorm(swish(dot_bf16(h4, w5) + b5[...] + h_sum), g5, be5)

    # Fused fc_mu / fc_logvar: one (hidden, 2*latent_p) matmul, then split.
    heads = dot_bf16(h5, wheads) + bheads[...]
    post_mu = heads[:, :latent_p]
    post_logvar = heads[:, latent_p:]

    # --- mixture of log-normal densities (constants folded) ---
    z2 = z * z
    # standard prior: mu=0, logvar=0 -> -0.5*(log(2*pi) + z^2)
    g_stnd = -0.5 * (LOG_2PI + z2) + LOG_W[0]
    # uniform prior: mu=0, logvar=10 -> -0.5*(10 + log(2*pi) + z^2 * exp(-10))
    g_unif = -0.5 * (10.0 + LOG_2PI + z2 * EXP_NEG_10) + LOG_W[2]
    # posterior prior: exp(-logvar) multiply instead of divide by exp(logvar)
    diff = z - post_mu
    g_post = -0.5 * (post_logvar + LOG_2PI + diff * diff * jnp.exp(-post_logvar)) + LOG_W[1]

    # logsumexp over the 3 mixture components
    m = jnp.maximum(jnp.maximum(g_stnd, g_post), g_unif)
    out = m + jnp.log(
        jnp.exp(g_stnd - m) + jnp.exp(g_post - m) + jnp.exp(g_unif - m)
    )
    out_ref[...] = out.astype(out_ref.dtype)


def make_params(key, input_dim, hidden_dim, latent_dim):
    """Deterministic synthetic encoder_old parameters (PyTorch-like init, transposed weights)."""
    keys = jax.random.split(key, 16)
    k = iter(keys)

    def lin_params(kw, kb, fan_in, fan_out):
        bound = 1.0 / np.sqrt(fan_in)
        w = jax.random.uniform(kw, (fan_in, fan_out), jnp.float32, -bound, bound)
        b = jax.random.uniform(kb, (1, fan_out), jnp.float32, -bound, bound)
        return w, b

    params = []
    # fc1..fc5
    w, b = lin_params(next(k), next(k), input_dim, hidden_dim)
    params += [w, b]
    for _ in range(4):
        w, b = lin_params(next(k), next(k), hidden_dim, hidden_dim)
        params += [w, b]
    # LayerNorm affine params (PyTorch default init: weight=1, bias=0), kept 2D for VMEM
    ln_params = []
    for _ in range(5):
        ln_params += [jnp.ones((1, hidden_dim), jnp.float32),
                      jnp.zeros((1, hidden_dim), jnp.float32)]
    # heads
    wmu, bmu = lin_params(next(k), next(k), hidden_dim, latent_dim)
    wlv, blv = lin_params(next(k), next(k), hidden_dim, latent_dim)
    return params + ln_params + [wmu, bmu, wlv, blv]


def _pad_axis(a, axis, target):
    pad = target - a.shape[axis]
    if pad <= 0:
        return a
    widths = [(0, 0)] * a.ndim
    widths[axis] = (0, pad)
    return jnp.pad(a, widths)


def _round_up(n, m):
    return ((n + m - 1) // m) * m


def composite_prior_forward(x, z, params, *, tile_b=256, lane=128):
    """Batch-tiled Pallas forward with bf16 matmul operands and lane-padded hidden/latent."""
    (w1, b1, w2, b2, w3, b3, w4, b4, w5, b5,
     g1, be1, g2, be2, g3, be3, g4, be4, g5, be5,
     wmu, bmu, wlv, blv) = params

    B, input_dim = x.shape
    _, latent_dim = z.shape
    hidden_dim = w1.shape[1]

    # Lane-dense padding: hidden and latent dims padded to 128-lane multiples.  All padded
    # weight columns / gains / biases are zero, so padded hidden lanes stay exactly zero
    # through the residual chain (see layernorm() comment); padded latent lanes are finite
    # and sliced off below.
    hidden_p = _round_up(hidden_dim, lane)
    latent_p = max(lane, _round_up(latent_dim, lane))

    def pad_h_cols(a):
        return _pad_axis(a, 1, hidden_p)

    w1_p = pad_h_cols(w1)
    b1_p, g1_p, be1_p = pad_h_cols(b1), pad_h_cols(g1), pad_h_cols(be1)
    hidden_ws = []
    for w, b, g, be in ((w2, b2, g2, be2), (w3, b3, g3, be3),
                        (w4, b4, g4, be4), (w5, b5, g5, be5)):
        hidden_ws += [_pad_axis(pad_h_cols(w), 0, hidden_p),
                      pad_h_cols(b), pad_h_cols(g), pad_h_cols(be)]
    (w2_p, b2_p, g2_p, be2_p, w3_p, b3_p, g3_p, be3_p,
     w4_p, b4_p, g4_p, be4_p, w5_p, b5_p, g5_p, be5_p) = hidden_ws

    # Fused mu/logvar head: concat along the output axis -> one N = 2*latent_p matmul.
    wmu_p = _pad_axis(_pad_axis(wmu, 0, hidden_p), 1, latent_p)
    wlv_p = _pad_axis(_pad_axis(wlv, 0, hidden_p), 1, latent_p)
    wheads = jnp.concatenate([wmu_p, wlv_p], axis=1)
    bheads = jnp.concatenate([_pad_axis(bmu, 1, latent_p),
                              _pad_axis(blv, 1, latent_p)], axis=1)

    # bf16 weight matrices for the MXU; biases / LN params stay f32.
    w1_p, w2_p, w3_p, w4_p, w5_p, wheads = (
        a.astype(jnp.bfloat16) for a in (w1_p, w2_p, w3_p, w4_p, w5_p, wheads))

    z_p = _pad_axis(z, 1, latent_p)

    # Batch tiling: for small batches use a single grid step (tb = B rounded up to 8 sublanes);
    # for large batches use tile_b (>= 2 tiles, so "parallel" can shard across v7x's 2 TCs).
    if B <= tile_b:
        tb = _round_up(B, 8)
    else:
        tb = tile_b
    B_p = _round_up(B, tb)
    x_p = _pad_axis(x, 0, B_p)
    z_p = _pad_axis(z_p, 0, B_p)

    grid = (B_p // tb,)

    def row_spec(shape):
        return pl.BlockSpec(shape, lambda i: (i, 0))

    def const_spec(a):
        # Constant block index -> parameter stays VMEM-resident across grid steps.
        return pl.BlockSpec(a.shape, lambda i: (0, 0))

    weight_args = [w1_p, b1_p, w2_p, b2_p, w3_p, b3_p, w4_p, b4_p, w5_p, b5_p,
                   g1_p, be1_p, g2_p, be2_p, g3_p, be3_p, g4_p, be4_p, g5_p, be5_p,
                   wheads, bheads]

    in_specs = ([row_spec((tb, input_dim)), row_spec((tb, latent_p))]
                + [const_spec(a) for a in weight_args])

    # VMEM budget: params (possibly double-buffered by the pipeline) + double-buffered
    # x/z/out tiles + headroom, capped at 48 MiB so the same launch leaves the compiler
    # scratch/spill headroom on v7x's 64 MiB physical VMEM.
    param_bytes = sum(int(np.prod(a.shape)) * a.dtype.itemsize for a in weight_args)
    tile_bytes = 2 * 4 * (tb * input_dim + 2 * tb * latent_p)   # x2 for double buffering
    vmem_limit = int(min(48 << 20, max(16 << 20, 2 * param_bytes + tile_bytes + (8 << 20))))

    # Advisory cost estimate so XLA schedules the wrapper-side pads/slices around the kernel.
    flops = 2 * B_p * (input_dim * hidden_p + 4 * hidden_p * hidden_p
                       + hidden_p * 2 * latent_p)
    transcendentals = 9 * B_p * hidden_p
    bytes_accessed = (int(np.prod(x_p.shape)) * 4 + int(np.prod(z_p.shape)) * 4
                      + param_bytes + B_p * latent_p * 4)

    kernel = functools.partial(composite_prior_kernel,
                               hidden_dim=hidden_dim, latent_p=latent_p)

    out = pl.pallas_call(
        kernel,
        out_shape=jax.ShapeDtypeStruct((B_p, latent_p), jnp.float32),
        grid=grid,
        in_specs=in_specs,
        out_specs=row_spec((tb, latent_p)),
        compiler_params=pltpu.CompilerParams(
            dimension_semantics=("parallel",),
            vmem_limit_bytes=vmem_limit,
        ),
        cost_estimate=pl.CostEstimate(
            flops=int(flops),
            transcendentals=int(transcendentals),
            bytes_accessed=int(bytes_accessed),
        ),
    )(x_p, z_p, *weight_args)

    return out[:B, :latent_dim]


def reference_forward(x, z, params):
    """Pure-JAX f32 reference, mirroring the PyTorch module."""
    (w1, b1, w2, b2, w3, b3, w4, b4, w5, b5,
     g1, be1, g2, be2, g3, be3, g4, be4, g5, be5,
     wmu, bmu, wlv, blv) = params

    def lin(v, w, b): return v @ w + b
    def sw(v): return v * jax.nn.sigmoid(v)

    def ln(v, g, b):
        mean = jnp.mean(v, -1, keepdims=True)
        var = jnp.mean((v - mean) ** 2, -1, keepdims=True)
        return (v - mean) / jnp.sqrt(var + LN_EPS) * g + b

    sq = jnp.sum(x * x, -1, keepdims=True)
    xn = x / jnp.sqrt(jnp.maximum(sq, NORM_SQ_MIN))
    h1 = ln(sw(lin(xn, w1, b1)), g1, be1)
    h2 = ln(sw(lin(h1, w2, b2) + h1), g2, be2)
    h3 = ln(sw(lin(h2, w3, b3) + h1 + h2), g3, be3)
    h4 = ln(sw(lin(h3, w4, b4) + h1 + h2 + h3), g4, be4)
    h5 = ln(sw(lin(h4, w5, b5) + h1 + h2 + h3 + h4), g5, be5)
    mu, lv = lin(h5, wmu, bmu), lin(h5, wlv, blv)

    def lnp(zz, m_, l_): return -0.5 * (l_ + LOG_2PI + (zz - m_) ** 2 / jnp.exp(l_))
    gs = [lnp(z, 0.0, jnp.zeros_like(z)) + np.log(MIX_W[0]),
          lnp(z, mu, lv) + np.log(MIX_W[1]),
          lnp(z, 0.0, jnp.full_like(z, 10.0)) + np.log(MIX_W[2])]
    return jax.scipy.special.logsumexp(jnp.stack(gs, -1), axis=-1)


if __name__ == "__main__":
    # Small but structure-exercising shapes: batch not a multiple of 128 (tests row padding,
    # single-step grid), latent < 128 (tests lane padding + slice-back), hidden = 128
    # (lane-dense MXU tiles; non-128-multiple hidden dims are padded by the wrapper).
    B, INPUT_DIM, HIDDEN_DIM, LATENT_DIM = 40, 384, 128, 64

    key = jax.random.PRNGKey(0)
    kx, kz, kp = jax.random.split(key, 3)
    # x is a (sparse-ish) interaction matrix in the original model; any nonzero rows work
    x = jnp.abs(jax.random.normal(kx, (B, INPUT_DIM), jnp.float32)) + 0.1
    z = jax.random.normal(kz, (B, LATENT_DIM), jnp.float32)
    params = make_params(kp, INPUT_DIM, HIDDEN_DIM, LATENT_DIM)

    out = composite_prior_forward(x, z, params)   # single 40-row grid step
    out = jax.block_until_ready(out)

    ref = reference_forward(x, z, params)
    # bf16 matmul operands (f32 accumulation) vs. f32 reference -> slightly looser tolerance.
    np.testing.assert_allclose(np.asarray(out), np.asarray(ref), rtol=2e-2, atol=2e-2)

    print("KERNEL_OK")
</pallas_src>

<mosaic_0001>
module attributes {stable_mosaic.version = 11 : i64} {
  func.func @composite_prior_kernel(%arg0: i32, %arg1: memref<40x384xf32, #tpu.memory_space<vmem>>, %arg2: memref<40x128xf32, #tpu.memory_space<vmem>>, %arg3: memref<384x128xbf16, #tpu.memory_space<vmem>>, %arg4: memref<1x128xf32, #tpu.memory_space<vmem>>, %arg5: memref<128x128xbf16, #tpu.memory_space<vmem>>, %arg6: memref<1x128xf32, #tpu.memory_space<vmem>>, %arg7: memref<128x128xbf16, #tpu.memory_space<vmem>>, %arg8: memref<1x128xf32, #tpu.memory_space<vmem>>, %arg9: memref<128x128xbf16, #tpu.memory_space<vmem>>, %arg10: memref<1x128xf32, #tpu.memory_space<vmem>>, %arg11: memref<128x128xbf16, #tpu.memory_space<vmem>>, %arg12: memref<1x128xf32, #tpu.memory_space<vmem>>, %arg13: memref<1x128xf32, #tpu.memory_space<vmem>>, %arg14: memref<1x128xf32, #tpu.memory_space<vmem>>, %arg15: memref<1x128xf32, #tpu.memory_space<vmem>>, %arg16: memref<1x128xf32, #tpu.memory_space<vmem>>, %arg17: memref<1x128xf32, #tpu.memory_space<vmem>>, %arg18: memref<1x128xf32, #tpu.memory_space<vmem>>, %arg19: memref<1x128xf32, #tpu.memory_space<vmem>>, %arg20: memref<1x128xf32, #tpu.memory_space<vmem>>, %arg21: memref<1x128xf32, #tpu.memory_space<vmem>>, %arg22: memref<1x128xf32, #tpu.memory_space<vmem>>, %arg23: memref<128x256xbf16, #tpu.memory_space<vmem>>, %arg24: memref<1x256xf32, #tpu.memory_space<vmem>>, %arg25: memref<40x128xf32, #tpu.memory_space<vmem>>) attributes {dimension_semantics = [#tpu.dimension_semantics<parallel>], iteration_bounds = array<i64: 1>, scalar_prefetch = 0 : i64, scratch_operands = 0 : i64, tpu.core_type = #tpu.core_type<tc>, window_params = [{transform_indices = @transform_0, window_bounds = array<i64: 40, 384>}, {transform_indices = @transform_1, window_bounds = array<i64: 40, 128>}, {pipeline_mode = #tpu.pipeline_mode<synchronous>, transform_indices = @transform_2, window_bounds = array<i64: 384, 128>}, {pipeline_mode = #tpu.pipeline_mode<synchronous>, transform_indices = @transform_3, window_bounds = array<i64: 1, 128>}, {pipeline_mode = #tpu.pipeline_mode<synchronous>, transform_indices = @transform_4, window_bounds = array<i64: 128, 128>}, {pipeline_mode = #tpu.pipeline_mode<synchronous>, transform_indices = @transform_5, window_bounds = array<i64: 1, 128>}, {pipeline_mode = #tpu.pipeline_mode<synchronous>, transform_indices = @transform_6, window_bounds = array<i64: 128, 128>}, {pipeline_mode = #tpu.pipeline_mode<synchronous>, transform_indices = @transform_7, window_bounds = array<i64: 1, 128>}, {pipeline_mode = #tpu.pipeline_mode<synchronous>, transform_indices = @transform_8, window_bounds = array<i64: 128, 128>}, {pipeline_mode = #tpu.pipeline_mode<synchronous>, transform_indices = @transform_9, window_bounds = array<i64: 1, 128>}, {pipeline_mode = #tpu.pipeline_mode<synchronous>, transform_indices = @transform_10, window_bounds = array<i64: 128, 128>}, {pipeline_mode = #tpu.pipeline_mode<synchronous>, transform_indices = @transform_11, window_bounds = array<i64: 1, 128>}, {pipeline_mode = #tpu.pipeline_mode<synchronous>, transform_indices = @transform_12, window_bounds = array<i64: 1, 128>}, {pipeline_mode = #tpu.pipeline_mode<synchronous>, transform_indices = @transform_13, window_bounds = array<i64: 1, 128>}, {pipeline_mode = #tpu.pipeline_mode<synchronous>, transform_indices = @transform_14, window_bounds = array<i64: 1, 128>}, {pipeline_mode = #tpu.pipeline_mode<synchronous>, transform_indices = @transform_15, window_bounds = array<i64: 1, 128>}, {pipeline_mode = #tpu.pipeline_mode<synchronous>, transform_indices = @transform_16, window_bounds = array<i64: 1, 128>}, {pipeline_mode = #tpu.pipeline_mode<synchronous>, transform_indices = @transform_17, window_bounds = array<i64: 1, 128>}, {pipeline_mode = #tpu.pipeline_mode<synchronous>, transform_indices = @transform_18, window_bounds = array<i64: 1, 128>}, {pipeline_mode = #tpu.pipeline_mode<synchronous>, transform_indices = @transform_19, window_bounds = array<i64: 1, 128>}, {pipeline_mode = #tpu.pipeline_mode<synchronous>, transform_indices = @transform_20, window_bounds = array<i64: 1, 128>}, {pipeline_mode = #tpu.pipeline_mode<synchronous>, transform_indices = @transform_21, window_bounds = array<i64: 1, 128>}, {pipeline_mode = #tpu.pipeline_mode<synchronous>, transform_indices = @transform_22, window_bounds = array<i64: 128, 256>}, {pipeline_mode = #tpu.pipeline_mode<synchronous>, transform_indices = @transform_23, window_bounds = array<i64: 1, 256>}, {transform_indices = @transform_24, window_bounds = array<i64: 40, 128>}]} {
    %c0 = arith.constant 0 : index
    %c0_0 = arith.constant 0 : index
    %0 = vector.load %arg1[%c0, %c0_0] : memref<40x384xf32, #tpu.memory_space<vmem>>, vector<40x384xf32>
    %c0_1 = arith.constant 0 : index
    %c0_2 = arith.constant 0 : index
    %1 = vector.load %arg2[%c0_1, %c0_2] : memref<40x128xf32, #tpu.memory_space<vmem>>, vector<40x128xf32>
    %2 = arith.mulf %0, %0 : vector<40x384xf32>
    %cst = arith.constant dense<0.000000e+00> : vector<40xf32>
    %3 = vector.multi_reduction <add>, %2, %cst [1] : vector<40x384xf32> to vector<40xf32>
    %4 = vector.shape_cast %3 : vector<40xf32> to vector<40x1xf32>
    %cst_3 = arith.constant 1.000000e-24 : f32
    %5 = vector.broadcast %cst_3 : f32 to vector<40x1xf32>
    %6 = arith.maximumf %4, %5 : vector<40x1xf32>
    %7 = math.rsqrt %6 : vector<40x1xf32>
    %8 = arith.truncf %0 : vector<40x384xf32> to vector<40x384xbf16>
    %c0_4 = arith.constant 0 : index
    %c0_5 = arith.constant 0 : index
    %9 = vector.load %arg3[%c0_4, %c0_5] : memref<384x128xbf16, #tpu.memory_space<vmem>>, vector<384x128xbf16>
    %cst_6 = arith.constant dense<0.000000e+00> : vector<40x128xf32>
    %10 = tpu.matmul %8, %9, %cst_6 {dimension_numbers = #tpu.dot_dimension_numbers<[1], [0], [0], [1], [0, 0, 1, 1], [], []>} : vector<40x384xbf16>, vector<384x128xbf16>, vector<40x128xf32> -> vector<40x128xf32>
    %11 = vector.broadcast %7 : vector<40x1xf32> to vector<40x128xf32>
    %12 = arith.mulf %11, %10 : vector<40x128xf32>
    %c0_7 = arith.constant 0 : index
    %c0_8 = arith.constant 0 : index
    %13 = vector.load %arg4[%c0_7, %c0_8] : memref<1x128xf32, #tpu.memory_space<vmem>>, vector<1x128xf32>
    %14 = vector.broadcast %13 : vector<1x128xf32> to vector<40x128xf32>
    %15 = arith.addf %12, %14 : vector<40x128xf32>
    %16 = arith.negf %15 : vector<40x128xf32>
    %17 = math.exp %16 : vector<40x128xf32>
    %cst_9 = arith.constant 1.000000e+00 : f32
    %18 = vector.broadcast %cst_9 : f32 to vector<40x128xf32>
    %19 = arith.addf %18, %17 : vector<40x128xf32>
    %20 = arith.divf %18, %19 : vector<40x128xf32>
    %21 = arith.mulf %15, %20 : vector<40x128xf32>
    %cst_10 = arith.constant dense<0.000000e+00> : vector<40xf32>
    %22 = vector.multi_reduction <add>, %21, %cst_10 [1] : vector<40x128xf32> to vector<40xf32>
    %23 = vector.shape_cast %22 : vector<40xf32> to vector<40x1xf32>
    %cst_11 = arith.constant 7.812500e-03 : f32
    %24 = vector.broadcast %cst_11 : f32 to vector<40x1xf32>
    %25 = arith.mulf %23, %24 : vector<40x1xf32>
    %26 = arith.mulf %21, %21 : vector<40x128xf32>
    %cst_12 = arith.constant dense<0.000000e+00> : vector<40xf32>
    %27 = vector.multi_reduction <add>, %26, %cst_12 [1] : vector<40x128xf32> to vector<40xf32>
    %28 = vector.shape_cast %27 : vector<40xf32> to vector<40x1xf32>
    %cst_13 = arith.constant 7.812500e-03 : f32
    %29 = vector.broadcast %cst_13 : f32 to vector<40x1xf32>
    %30 = arith.mulf %28, %29 : vector<40x1xf32>
    %31 = arith.mulf %25, %25 : vector<40x1xf32>
    %32 = arith.subf %30, %31 : vector<40x1xf32>
    %33 = vector.broadcast %25 : vector<40x1xf32> to vector<40x128xf32>
    %34 = arith.subf %21, %33 : vector<40x128xf32>
    %cst_14 = arith.constant 1.000000e-01 : f32
    %35 = vector.broadcast %cst_14 : f32 to vector<40x1xf32>
    %36 = arith.addf %32, %35 : vector<40x1xf32>
    %37 = math.rsqrt %36 : vector<40x1xf32>
    %38 = vector.broadcast %37 : vector<40x1xf32> to vector<40x128xf32>
    %39 = arith.mulf %34, %38 : vector<40x128xf32>
    %c0_15 = arith.constant 0 : index
    %c0_16 = arith.constant 0 : index
    %40 = vector.load %arg13[%c0_15, %c0_16] : memref<1x128xf32, #tpu.memory_space<vmem>>, vector<1x128xf32>
    %41 = vector.broadcast %40 : vector<1x128xf32> to vector<40x128xf32>
    %42 = arith.mulf %39, %41 : vector<40x128xf32>
    %c0_17 = arith.constant 0 : index
    %c0_18 = arith.constant 0 : index
    %43 = vector.load %arg14[%c0_17, %c0_18] : memref<1x128xf32, #tpu.memory_space<vmem>>, vector<1x128xf32>
    %44 = vector.broadcast %43 : vector<1x128xf32> to vector<40x128xf32>
    %45 = arith.addf %42, %44 : vector<40x128xf32>
    %46 = arith.truncf %45 : vector<40x128xf32> to vector<40x128xbf16>
    %c0_19 = arith.constant 0 : index
    %c0_20 = arith.constant 0 : index
    %47 = vector.load %arg5[%c0_19, %c0_20] : memref<128x128xbf16, #tpu.memory_space<vmem>>, vector<128x128xbf16>
    %cst_21 = arith.constant dense<0.000000e+00> : vector<40x128xf32>
    %48 = tpu.matmul %46, %47, %cst_21 {dimension_numbers = #tpu.dot_dimension_numbers<[1], [0], [0], [1], [0, 0, 1, 1], [], []>} : vector<40x128xbf16>, vector<128x128xbf16>, vector<40x128xf32> -> vector<40x128xf32>
    %c0_22 = arith.constant 0 : index
    %c0_23 = arith.constant 0 : index
    %49 = vector.load %arg6[%c0_22, %c0_23] : memref<1x128xf32, #tpu.memory_space<vmem>>, vector<1x128xf32>
    %50 = vector.broadcast %49 : vector<1x128xf32> to vector<40x128xf32>
    %51 = arith.addf %48, %50 : vector<40x128xf32>
    %52 = arith.addf %51, %45 : vector<40x128xf32>
    %53 = arith.negf %52 : vector<40x128xf32>
    %54 = math.exp %53 : vector<40x128xf32>
    %cst_24 = arith.constant 1.000000e+00 : f32
    %55 = vector.broadcast %cst_24 : f32 to vector<40x128xf32>
    %56 = arith.addf %55, %54 : vector<40x128xf32>
    %57 = arith.divf %55, %56 : vector<40x128xf32>
    %58 = arith.mulf %52, %57 : vector<40x128xf32>
    %cst_25 = arith.constant dense<0.000000e+00> : vector<40xf32>
    %59 = vector.multi_reduction <add>, %58, %cst_25 [1] : vector<40x128xf32> to vector<40xf32>
    %60 = vector.shape_cast %59 : vector<40xf32> to vector<40x1xf32>
    %cst_26 = arith.constant 7.812500e-03 : f32
    %61 = vector.broadcast %cst_26 : f32 to vector<40x1xf32>
    %62 = arith.mulf %60, %61 : vector<40x1xf32>
    %63 = arith.mulf %58, %58 : vector<40x128xf32>
    %cst_27 = arith.constant dense<0.000000e+00> : vector<40xf32>
    %64 = vector.multi_reduction <add>, %63, %cst_27 [1] : vector<40x128xf32> to vector<40xf32>
    %65 = vector.shape_cast %64 : vector<40xf32> to vector<40x1xf32>
    %cst_28 = arith.constant 7.812500e-03 : f32
    %66 = vector.broadcast %cst_28 : f32 to vector<40x1xf32>
    %67 = arith.mulf %65, %66 : vector<40x1xf32>
    %68 = arith.mulf %62, %62 : vector<40x1xf32>
    %69 = arith.subf %67, %68 : vector<40x1xf32>
    %70 = vector.broadcast %62 : vector<40x1xf32> to vector<40x128xf32>
    %71 = arith.subf %58, %70 : vector<40x128xf32>
    %cst_29 = arith.constant 1.000000e-01 : f32
    %72 = vector.broadcast %cst_29 : f32 to vector<40x1xf32>
    %73 = arith.addf %69, %72 : vector<40x1xf32>
    %74 = math.rsqrt %73 : vector<40x1xf32>
    %75 = vector.broadcast %74 : vector<40x1xf32> to vector<40x128xf32>
    %76 = arith.mulf %71, %75 : vector<40x128xf32>
    %c0_30 = arith.constant 0 : index
    %c0_31 = arith.constant 0 : index
    %77 = vector.load %arg15[%c0_30, %c0_31] : memref<1x128xf32, #tpu.memory_space<vmem>>, vector<1x128xf32>
    %78 = vector.broadcast %77 : vector<1x128xf32> to vector<40x128xf32>
    %79 = arith.mulf %76, %78 : vector<40x128xf32>
    %c0_32 = arith.constant 0 : index
    %c0_33 = arith.constant 0 : index
    %80 = vector.load %arg16[%c0_32, %c0_33] : memref<1x128xf32, #tpu.memory_space<vmem>>, vector<1x128xf32>
    %81 = vector.broadcast %80 : vector<1x128xf32> to vector<40x128xf32>
    %82 = arith.addf %79, %81 : vector<40x128xf32>
    %83 = arith.addf %45, %82 : vector<40x128xf32>
    %84 = arith.truncf %82 : vector<40x128xf32> to vector<40x128xbf16>
    %c0_34 = arith.constant 0 : index
    %c0_35 = arith.constant 0 : index
    %85 = vector.load %arg7[%c0_34, %c0_35] : memref<128x128xbf16, #tpu.memory_space<vmem>>, vector<128x128xbf16>
    %cst_36 = arith.constant dense<0.000000e+00> : vector<40x128xf32>
    %86 = tpu.matmul %84, %85, %cst_36 {dimension_numbers = #tpu.dot_dimension_numbers<[1], [0], [0], [1], [0, 0, 1, 1], [], []>} : vector<40x128xbf16>, vector<128x128xbf16>, vector<40x128xf32> -> vector<40x128xf32>
    %c0_37 = arith.constant 0 : index
    %c0_38 = arith.constant 0 : index
    %87 = vector.load %arg8[%c0_37, %c0_38] : memref<1x128xf32, #tpu.memory_space<vmem>>, vector<1x128xf32>
    %88 = vector.broadcast %87 : vector<1x128xf32> to vector<40x128xf32>
    %89 = arith.addf %86, %88 : vector<40x128xf32>
    %90 = arith.addf %89, %83 : vector<40x128xf32>
    %91 = arith.negf %90 : vector<40x128xf32>
    %92 = math.exp %91 : vector<40x128xf32>
    %cst_39 = arith.constant 1.000000e+00 : f32
    %93 = vector.broadcast %cst_39 : f32 to vector<40x128xf32>
    %94 = arith.addf %93, %92 : vector<40x128xf32>
    %95 = arith.divf %93, %94 : vector<40x128xf32>
    %96 = arith.mulf %90, %95 : vector<40x128xf32>
    %cst_40 = arith.constant dense<0.000000e+00> : vector<40xf32>
    %97 = vector.multi_reduction <add>, %96, %cst_40 [1] : vector<40x128xf32> to vector<40xf32>
    %98 = vector.shape_cast %97 : vector<40xf32> to vector<40x1xf32>
    %cst_41 = arith.constant 7.812500e-03 : f32
    %99 = vector.broadcast %cst_41 : f32 to vector<40x1xf32>
    %100 = arith.mulf %98, %99 : vector<40x1xf32>
    %101 = arith.mulf %96, %96 : vector<40x128xf32>
    %cst_42 = arith.constant dense<0.000000e+00> : vector<40xf32>
    %102 = vector.multi_reduction <add>, %101, %cst_42 [1] : vector<40x128xf32> to vector<40xf32>
    %103 = vector.shape_cast %102 : vector<40xf32> to vector<40x1xf32>
    %cst_43 = arith.constant 7.812500e-03 : f32
    %104 = vector.broadcast %cst_43 : f32 to vector<40x1xf32>
    %105 = arith.mulf %103, %104 : vector<40x1xf32>
    %106 = arith.mulf %100, %100 : vector<40x1xf32>
    %107 = arith.subf %105, %106 : vector<40x1xf32>
    %108 = vector.broadcast %100 : vector<40x1xf32> to vector<40x128xf32>
    %109 = arith.subf %96, %108 : vector<40x128xf32>
    %cst_44 = arith.constant 1.000000e-01 : f32
    %110 = vector.broadcast %cst_44 : f32 to vector<40x1xf32>
    %111 = arith.addf %107, %110 : vector<40x1xf32>
    %112 = math.rsqrt %111 : vector<40x1xf32>
    %113 = vector.broadcast %112 : vector<40x1xf32> to vector<40x128xf32>
    %114 = arith.mulf %109, %113 : vector<40x128xf32>
    %c0_45 = arith.constant 0 : index
    %c0_46 = arith.constant 0 : index
    %115 = vector.load %arg17[%c0_45, %c0_46] : memref<1x128xf32, #tpu.memory_space<vmem>>, vector<1x128xf32>
    %116 = vector.broadcast %115 : vector<1x128xf32> to vector<40x128xf32>
    %117 = arith.mulf %114, %116 : vector<40x128xf32>
    %c0_47 = arith.constant 0 : index
    %c0_48 = arith.constant 0 : index
    %118 = vector.load %arg18[%c0_47, %c0_48] : memref<1x128xf32, #tpu.memory_space<vmem>>, vector<1x128xf32>
    %119 = vector.broadcast %118 : vector<1x128xf32> to vector<40x128xf32>
    %120 = arith.addf %117, %119 : vector<40x128xf32>
    %121 = arith.addf %83, %120 : vector<40x128xf32>
    %122 = arith.truncf %120 : vector<40x128xf32> to vector<40x128xbf16>
    %c0_49 = arith.constant 0 : index
    %c0_50 = arith.constant 0 : index
    %123 = vector.load %arg9[%c0_49, %c0_50] : memref<128x128xbf16, #tpu.memory_space<vmem>>, vector<128x128xbf16>
    %cst_51 = arith.constant dense<0.000000e+00> : vector<40x128xf32>
    %124 = tpu.matmul %122, %123, %cst_51 {dimension_numbers = #tpu.dot_dimension_numbers<[1], [0], [0], [1], [0, 0, 1, 1], [], []>} : vector<40x128xbf16>, vector<128x128xbf16>, vector<40x128xf32> -> vector<40x128xf32>
    %c0_52 = arith.constant 0 : index
    %c0_53 = arith.constant 0 : index
    %125 = vector.load %arg10[%c0_52, %c0_53] : memref<1x128xf32, #tpu.memory_space<vmem>>, vector<1x128xf32>
    %126 = vector.broadcast %125 : vector<1x128xf32> to vector<40x128xf32>
    %127 = arith.addf %124, %126 : vector<40x128xf32>
    %128 = arith.addf %127, %121 : vector<40x128xf32>
    %129 = arith.negf %128 : vector<40x128xf32>
    %130 = math.exp %129 : vector<40x128xf32>
    %cst_54 = arith.constant 1.000000e+00 : f32
    %131 = vector.broadcast %cst_54 : f32 to vector<40x128xf32>
    %132 = arith.addf %131, %130 : vector<40x128xf32>
    %133 = arith.divf %131, %132 : vector<40x128xf32>
    %134 = arith.mulf %128, %133 : vector<40x128xf32>
    %cst_55 = arith.constant dense<0.000000e+00> : vector<40xf32>
    %135 = vector.multi_reduction <add>, %134, %cst_55 [1] : vector<40x128xf32> to vector<40xf32>
    %136 = vector.shape_cast %135 : vector<40xf32> to vector<40x1xf32>
    %cst_56 = arith.constant 7.812500e-03 : f32
    %137 = vector.broadcast %cst_56 : f32 to vector<40x1xf32>
    %138 = arith.mulf %136, %137 : vector<40x1xf32>
    %139 = arith.mulf %134, %134 : vector<40x128xf32>
    %cst_57 = arith.constant dense<0.000000e+00> : vector<40xf32>
    %140 = vector.multi_reduction <add>, %139, %cst_57 [1] : vector<40x128xf32> to vector<40xf32>
    %141 = vector.shape_cast %140 : vector<40xf32> to vector<40x1xf32>
    %cst_58 = arith.constant 7.812500e-03 : f32
    %142 = vector.broadcast %cst_58 : f32 to vector<40x1xf32>
    %143 = arith.mulf %141, %142 : vector<40x1xf32>
    %144 = arith.mulf %138, %138 : vector<40x1xf32>
    %145 = arith.subf %143, %144 : vector<40x1xf32>
    %146 = vector.broadcast %138 : vector<40x1xf32> to vector<40x128xf32>
    %147 = arith.subf %134, %146 : vector<40x128xf32>
    %cst_59 = arith.constant 1.000000e-01 : f32
    %148 = vector.broadcast %cst_59 : f32 to vector<40x1xf32>
    %149 = arith.addf %145, %148 : vector<40x1xf32>
    %150 = math.rsqrt %149 : vector<40x1xf32>
    %151 = vector.broadcast %150 : vector<40x1xf32> to vector<40x128xf32>
    %152 = arith.mulf %147, %151 : vector<40x128xf32>
    %c0_60 = arith.constant 0 : index
    %c0_61 = arith.constant 0 : index
    %153 = vector.load %arg19[%c0_60, %c0_61] : memref<1x128xf32, #tpu.memory_space<vmem>>, vector<1x128xf32>
    %154 = vector.broadcast %153 : vector<1x128xf32> to vector<40x128xf32>
    %155 = arith.mulf %152, %154 : vector<40x128xf32>
    %c0_62 = arith.constant 0 : index
    %c0_63 = arith.constant 0 : index
    %156 = vector.load %arg20[%c0_62, %c0_63] : memref<1x128xf32, #tpu.memory_space<vmem>>, vector<1x128xf32>
    %157 = vector.broadcast %156 : vector<1x128xf32> to vector<40x128xf32>
    %158 = arith.addf %155, %157 : vector<40x128xf32>
    %159 = arith.addf %121, %158 : vector<40x128xf32>
    %160 = arith.truncf %158 : vector<40x128xf32> to vector<40x128xbf16>
    %c0_64 = arith.constant 0 : index
    %c0_65 = arith.constant 0 : index
    %161 = vector.load %arg11[%c0_64, %c0_65] : memref<128x128xbf16, #tpu.memory_space<vmem>>, vector<128x128xbf16>
    %cst_66 = arith.constant dense<0.000000e+00> : vector<40x128xf32>
    %162 = tpu.matmul %160, %161, %cst_66 {dimension_numbers = #tpu.dot_dimension_numbers<[1], [0], [0], [1], [0, 0, 1, 1], [], []>} : vector<40x128xbf16>, vector<128x128xbf16>, vector<40x128xf32> -> vector<40x128xf32>
    %c0_67 = arith.constant 0 : index
    %c0_68 = arith.constant 0 : index
    %163 = vector.load %arg12[%c0_67, %c0_68] : memref<1x128xf32, #tpu.memory_space<vmem>>, vector<1x128xf32>
    %164 = vector.broadcast %163 : vector<1x128xf32> to vector<40x128xf32>
    %165 = arith.addf %162, %164 : vector<40x128xf32>
    %166 = arith.addf %165, %159 : vector<40x128xf32>
    %167 = arith.negf %166 : vector<40x128xf32>
    %168 = math.exp %167 : vector<40x128xf32>
    %cst_69 = arith.constant 1.000000e+00 : f32
    %169 = vector.broadcast %cst_69 : f32 to vector<40x128xf32>
    %170 = arith.addf %169, %168 : vector<40x128xf32>
    %171 = arith.divf %169, %170 : vector<40x128xf32>
    %172 = arith.mulf %166, %171 : vector<40x128xf32>
    %cst_70 = arith.constant dense<0.000000e+00> : vector<40xf32>
    %173 = vector.multi_reduction <add>, %172, %cst_70 [1] : vector<40x128xf32> to vector<40xf32>
    %174 = vector.shape_cast %173 : vector<40xf32> to vector<40x1xf32>
    %cst_71 = arith.constant 7.812500e-03 : f32
    %175 = vector.broadcast %cst_71 : f32 to vector<40x1xf32>
    %176 = arith.mulf %174, %175 : vector<40x1xf32>
    %177 = arith.mulf %172, %172 : vector<40x128xf32>
    %cst_72 = arith.constant dense<0.000000e+00> : vector<40xf32>
    %178 = vector.multi_reduction <add>, %177, %cst_72 [1] : vector<40x128xf32> to vector<40xf32>
    %179 = vector.shape_cast %178 : vector<40xf32> to vector<40x1xf32>
    %cst_73 = arith.constant 7.812500e-03 : f32
    %180 = vector.broadcast %cst_73 : f32 to vector<40x1xf32>
    %181 = arith.mulf %179, %180 : vector<40x1xf32>
    %182 = arith.mulf %176, %176 : vector<40x1xf32>
    %183 = arith.subf %181, %182 : vector<40x1xf32>
    %184 = vector.broadcast %176 : vector<40x1xf32> to vector<40x128xf32>
    %185 = arith.subf %172, %184 : vector<40x128xf32>
    %cst_74 = arith.constant 1.000000e-01 : f32
    %186 = vector.broadcast %cst_74 : f32 to vector<40x1xf32>
    %187 = arith.addf %183, %186 : vector<40x1xf32>
    %188 = math.rsqrt %187 : vector<40x1xf32>
    %189 = vector.broadcast %188 : vector<40x1xf32> to vector<40x128xf32>
    %190 = arith.mulf %185, %189 : vector<40x128xf32>
    %c0_75 = arith.constant 0 : index
    %c0_76 = arith.constant 0 : index
    %191 = vector.load %arg21[%c0_75, %c0_76] : memref<1x128xf32, #tpu.memory_space<vmem>>, vector<1x128xf32>
    %192 = vector.broadcast %191 : vector<1x128xf32> to vector<40x128xf32>
    %193 = arith.mulf %190, %192 : vector<40x128xf32>
    %c0_77 = arith.constant 0 : index
    %c0_78 = arith.constant 0 : index
    %194 = vector.load %arg22[%c0_77, %c0_78] : memref<1x128xf32, #tpu.memory_space<vmem>>, vector<1x128xf32>
    %195 = vector.broadcast %194 : vector<1x128xf32> to vector<40x128xf32>
    %196 = arith.addf %193, %195 : vector<40x128xf32>
    %197 = arith.truncf %196 : vector<40x128xf32> to vector<40x128xbf16>
    %c0_79 = arith.constant 0 : index
    %c0_80 = arith.constant 0 : index
    %198 = vector.load %arg23[%c0_79, %c0_80] : memref<128x256xbf16, #tpu.memory_space<vmem>>, vector<128x256xbf16>
    %cst_81 = arith.constant dense<0.000000e+00> : vector<40x256xf32>
    %199 = tpu.matmul %197, %198, %cst_81 {dimension_numbers = #tpu.dot_dimension_numbers<[1], [0], [0], [1], [0, 0, 1, 1], [], []>} : vector<40x128xbf16>, vector<128x256xbf16>, vector<40x256xf32> -> vector<40x256xf32>
    %c0_82 = arith.constant 0 : index
    %c0_83 = arith.constant 0 : index
    %200 = vector.load %arg24[%c0_82, %c0_83] : memref<1x256xf32, #tpu.memory_space<vmem>>, vector<1x256xf32>
    %201 = vector.broadcast %200 : vector<1x256xf32> to vector<40x256xf32>
    %202 = arith.addf %199, %201 : vector<40x256xf32>
    %203 = vector.extract_strided_slice %202 {offsets = [0, 0], sizes = [40, 128], strides = [1, 1]} : vector<40x256xf32> to vector<40x128xf32>
    %204 = vector.extract_strided_slice %202 {offsets = [0, 128], sizes = [40, 128], strides = [1, 1]} : vector<40x256xf32> to vector<40x128xf32>
    %205 = arith.mulf %1, %1 : vector<40x128xf32>
    %cst_84 = arith.constant 1.83787704 : f32
    %206 = vector.broadcast %cst_84 : f32 to vector<40x128xf32>
    %207 = arith.addf %206, %205 : vector<40x128xf32>
    %cst_85 = arith.constant -5.000000e-01 : f32
    %208 = vector.broadcast %cst_85 : f32 to vector<40x128xf32>
    %209 = arith.mulf %208, %207 : vector<40x128xf32>
    %cst_86 = arith.constant -1.897120e+00 : f32
    %210 = vector.broadcast %cst_86 : f32 to vector<40x128xf32>
    %211 = arith.addf %209, %210 : vector<40x128xf32>
    %cst_87 = arith.constant 4.5399931E-5 : f32
    %212 = vector.broadcast %cst_87 : f32 to vector<40x128xf32>
    %213 = arith.mulf %205, %212 : vector<40x128xf32>
    %cst_88 = arith.constant 11.8378773 : f32
    %214 = vector.broadcast %cst_88 : f32 to vector<40x128xf32>
    %215 = arith.addf %214, %213 : vector<40x128xf32>
    %cst_89 = arith.constant -5.000000e-01 : f32
    %216 = vector.broadcast %cst_89 : f32 to vector<40x128xf32>
    %217 = arith.mulf %216, %215 : vector<40x128xf32>
    %cst_90 = arith.constant -2.30258512 : f32
    %218 = vector.broadcast %cst_90 : f32 to vector<40x128xf32>
    %219 = arith.addf %217, %218 : vector<40x128xf32>
    %220 = arith.subf %1, %203 : vector<40x128xf32>
    %cst_91 = arith.constant 1.83787704 : f32
    %221 = vector.broadcast %cst_91 : f32 to vector<40x128xf32>
    %222 = arith.addf %204, %221 : vector<40x128xf32>
    %223 = arith.mulf %220, %220 : vector<40x128xf32>
    %cst_92 = arith.constant 0.000000e+00 : f32
    %224 = vector.broadcast %cst_92 : f32 to vector<40x128xf32>
    %225 = arith.subf %224, %204 : vector<40x128xf32>
    %226 = math.exp %225 : vector<40x128xf32>
    %227 = arith.mulf %223, %226 : vector<40x128xf32>
    %228 = arith.addf %222, %227 : vector<40x128xf32>
    %cst_93 = arith.constant -5.000000e-01 : f32
    %229 = vector.broadcast %cst_93 : f32 to vector<40x128xf32>
    %230 = arith.mulf %229, %228 : vector<40x128xf32>
    %cst_94 = arith.constant -0.287682086 : f32
    %231 = vector.broadcast %cst_94 : f32 to vector<40x128xf32>
    %232 = arith.addf %230, %231 : vector<40x128xf32>
    %233 = arith.maximumf %211, %232 : vector<40x128xf32>
    %234 = arith.maximumf %233, %219 : vector<40x128xf32>
    %235 = arith.subf %211, %234 : vector<40x128xf32>
    %236 = math.exp %235 : vector<40x128xf32>
    %237 = arith.subf %232, %234 : vector<40x128xf32>
    %238 = math.exp %237 : vector<40x128xf32>
    %239 = arith.addf %236, %238 : vector<40x128xf32>
    %240 = arith.subf %219, %234 : vector<40x128xf32>
    %241 = math.exp %240 : vector<40x128xf32>
    %242 = arith.addf %239, %241 : vector<40x128xf32>
    %243 = math.log %242 : vector<40x128xf32>
    %244 = arith.addf %234, %243 : vector<40x128xf32>
    %c0_95 = arith.constant 0 : index
    %c0_96 = arith.constant 0 : index
    %245 = vector.load %arg25[%c0_95, %c0_96] : memref<40x128xf32, #tpu.memory_space<vmem>>, vector<40x128xf32>
    tpu.vector_store %arg25[%c0_95, %c0_96], %244 {strides = array<i32>} : memref<40x128xf32, #tpu.memory_space<vmem>>, vector<40x128xf32>,
    return
  }
  func.func @transform_0(%arg0: i32) -> (i32, i32) {
    %c0_i32 = arith.constant 0 : i32
    %c0_i32_0 = arith.constant 0 : i32
    return %arg0, %c0_i32 : i32, i32
  }
  func.func @transform_1(%arg0: i32) -> (i32, i32) {
    %c0_i32 = arith.constant 0 : i32
    %c0_i32_0 = arith.constant 0 : i32
    return %arg0, %c0_i32 : i32, i32
  }
  func.func @transform_2(%arg0: i32) -> (i32, i32) {
    %c0_i32 = arith.constant 0 : i32
    %c0_i32_0 = arith.constant 0 : i32
    %c0_i32_1 = arith.constant 0 : i32
    return %c0_i32, %c0_i32_0 : i32, i32
  }
  func.func @transform_3(%arg0: i32) -> (i32, i32) {
    %c0_i32 = arith.constant 0 : i32
    %c0_i32_0 = arith.constant 0 : i32
    %c0_i32_1 = arith.constant 0 : i32
    return %c0_i32, %c0_i32_0 : i32, i32
  }
  func.func @transform_4(%arg0: i32) -> (i32, i32) {
    %c0_i32 = arith.constant 0 : i32
    %c0_i32_0 = arith.constant 0 : i32
    %c0_i32_1 = arith.constant 0 : i32
    return %c0_i32, %c0_i32_0 : i32, i32
  }
  func.func @transform_5(%arg0: i32) -> (i32, i32) {
    %c0_i32 = arith.constant 0 : i32
    %c0_i32_0 = arith.constant 0 : i32
    %c0_i32_1 = arith.constant 0 : i32
    return %c0_i32, %c0_i32_0 : i32, i32
  }
  func.func @transform_6(%arg0: i32) -> (i32, i32) {
    %c0_i32 = arith.constant 0 : i32
    %c0_i32_0 = arith.constant 0 : i32
    %c0_i32_1 = arith.constant 0 : i32
    return %c0_i32, %c0_i32_0 : i32, i32
  }
  func.func @transform_7(%arg0: i32) -> (i32, i32) {
    %c0_i32 = arith.constant 0 : i32
    %c0_i32_0 = arith.constant 0 : i32
    %c0_i32_1 = arith.constant 0 : i32
    return %c0_i32, %c0_i32_0 : i32, i32
  }
  func.func @transform_8(%arg0: i32) -> (i32, i32) {
    %c0_i32 = arith.constant 0 : i32
    %c0_i32_0 = arith.constant 0 : i32
    %c0_i32_1 = arith.constant 0 : i32
    return %c0_i32, %c0_i32_0 : i32, i32
  }
  func.func @transform_9(%arg0: i32) -> (i32, i32) {
    %c0_i32 = arith.constant 0 : i32
    %c0_i32_0 = arith.constant 0 : i32
    %c0_i32_1 = arith.constant 0 : i32
    return %c0_i32, %c0_i32_0 : i32, i32
  }
  func.func @transform_10(%arg0: i32) -> (i32, i32) {
    %c0_i32 = arith.constant 0 : i32
    %c0_i32_0 = arith.constant 0 : i32
    %c0_i32_1 = arith.constant 0 : i32
    return %c0_i32, %c0_i32_0 : i32, i32
  }
  func.func @transform_11(%arg0: i32) -> (i32, i32) {
    %c0_i32 = arith.constant 0 : i32
    %c0_i32_0 = arith.constant 0 : i32
    %c0_i32_1 = arith.constant 0 : i32
    return %c0_i32, %c0_i32_0 : i32, i32
  }
  func.func @transform_12(%arg0: i32) -> (i32, i32) {
    %c0_i32 = arith.constant 0 : i32
    %c0_i32_0 = arith.constant 0 : i32
    %c0_i32_1 = arith.constant 0 : i32
    return %c0_i32, %c0_i32_0 : i32, i32
  }
  func.func @transform_13(%arg0: i32) -> (i32, i32) {
    %c0_i32 = arith.constant 0 : i32
    %c0_i32_0 = arith.constant 0 : i32
    %c0_i32_1 = arith.constant 0 : i32
    return %c0_i32, %c0_i32_0 : i32, i32
  }
  func.func @transform_14(%arg0: i32) -> (i32, i32) {
    %c0_i32 = arith.constant 0 : i32
    %c0_i32_0 = arith.constant 0 : i32
    %c0_i32_1 = arith.constant 0 : i32
    return %c0_i32, %c0_i32_0 : i32, i32
  }
  func.func @transform_15(%arg0: i32) -> (i32, i32) {
    %c0_i32 = arith.constant 0 : i32
    %c0_i32_0 = arith.constant 0 : i32
    %c0_i32_1 = arith.constant 0 : i32
    return %c0_i32, %c0_i32_0 : i32, i32
  }
  func.func @transform_16(%arg0: i32) -> (i32, i32) {
    %c0_i32 = arith.constant 0 : i32
    %c0_i32_0 = arith.constant 0 : i32
    %c0_i32_1 = arith.constant 0 : i32
    return %c0_i32, %c0_i32_0 : i32, i32
  }
  func.func @transform_17(%arg0: i32) -> (i32, i32) {
    %c0_i32 = arith.constant 0 : i32
    %c0_i32_0 = arith.constant 0 : i32
    %c0_i32_1 = arith.constant 0 : i32
    return %c0_i32, %c0_i32_0 : i32, i32
  }
  func.func @transform_18(%arg0: i32) -> (i32, i32) {
    %c0_i32 = arith.constant 0 : i32
    %c0_i32_0 = arith.constant 0 : i32
    %c0_i32_1 = arith.constant 0 : i32
    return %c0_i32, %c0_i32_0 : i32, i32
  }
  func.func @transform_19(%arg0: i32) -> (i32, i32) {
    %c0_i32 = arith.constant 0 : i32
    %c0_i32_0 = arith.constant 0 : i32
    %c0_i32_1 = arith.constant 0 : i32
    return %c0_i32, %c0_i32_0 : i32, i32
  }
  func.func @transform_20(%arg0: i32) -> (i32, i32) {
    %c0_i32 = arith.constant 0 : i32
    %c0_i32_0 = arith.constant 0 : i32
    %c0_i32_1 = arith.constant 0 : i32
    return %c0_i32, %c0_i32_0 : i32, i32
  }
  func.func @transform_21(%arg0: i32) -> (i32, i32) {
    %c0_i32 = arith.constant 0 : i32
    %c0_i32_0 = arith.constant 0 : i32
    %c0_i32_1 = arith.constant 0 : i32
    return %c0_i32, %c0_i32_0 : i32, i32
  }
  func.func @transform_22(%arg0: i32) -> (i32, i32) {
    %c0_i32 = arith.constant 0 : i32
    %c0_i32_0 = arith.constant 0 : i32
    %c0_i32_1 = arith.constant 0 : i32
    return %c0_i32, %c0_i32_0 : i32, i32
  }
  func.func @transform_23(%arg0: i32) -> (i32, i32) {
    %c0_i32 = arith.constant 0 : i32
    %c0_i32_0 = arith.constant 0 : i32
    %c0_i32_1 = arith.constant 0 : i32
    return %c0_i32, %c0_i32_0 : i32, i32
  }
  func.func @transform_24(%arg0: i32) -> (i32, i32) {
    %c0_i32 = arith.constant 0 : i32
    %c0_i32_0 = arith.constant 0 : i32
    return %arg0, %c0_i32 : i32, i32
  }
}

</mosaic_0001>

<bundles_post_ra>
// kernel: tpu_custom_call.1
= control target key start
LH: loop header
LB: loop body
LE: loop exit
PB: predicated region body
PF: predicated region fallthrough
CT: control target
= control target key end

     0   :  { %s3576_s0 = inlined_call_operand.hbm [shape: f32[40,384], index: 0, kind: input, shape index: {}]   ;;  %s3577_s1 = inlined_call_operand.hbm [shape: f32[40,128], index: 1, kind: input, shape index: {}]   ;;  %s3578_s2 = inlined_call_operand.hbm [shape: bf16[384,128], index: 2, kind: input, shape index: {}]   ;;  %s3579_s3 = inlined_call_operand.vmem [shape: f32[1,128], index: 3, kind: input, shape index: {}]   ;;  %s3580_s4 = inlined_call_operand.hbm [shape: bf16[128,128], index: 4, kind: input, shape index: {}]   ;;  %s3581_s5 = inlined_call_operand.vmem [shape: f32[1,128], index: 5, kind: input, shape index: {}]   ;;  %s3582_s6 = inlined_call_operand.hbm [shape: bf16[128,128], index: 6, kind: input, shape index: {}]   ;;  %s3583_s7 = inlined_call_operand.vmem [shape: f32[1,128], index: 7, kind: input, shape index: {}]   ;;  %s3584_s8 = inlined_call_operand.hbm [shape: bf16[128,128], index: 8, kind: input, shape index: {}]   ;;  %s3585_s9 = inlined_call_operand.vmem [shape: f32[1,128], index: 9, kind: input, shape index: {}]   ;;  %s3586_s10 = inlined_call_operand.hbm [shape: bf16[128,128], index: 10, kind: input, shape index: {}]   ;;  %s3587_s11 = inlined_call_operand.vmem [shape: f32[1,128], index: 11, kind: input, shape index: {}]   ;;  %s3588_s12 = inlined_call_operand.vmem [shape: f32[1,128], index: 12, kind: input, shape index: {}]   ;;  %s3589_s13 = inlined_call_operand.vmem [shape: f32[1,128], index: 13, kind: input, shape index: {}]   ;;  %s3590_s14 = inlined_call_operand.vmem [shape: f32[1,128], index: 14, kind: input, shape index: {}]   ;;  %s3591_s15 = inlined_call_operand.vmem [shape: f32[1,128], index: 15, kind: input, shape index: {}]   ;;  %s3592_s16 = inlined_call_operand.vmem [shape: f32[1,128], index: 16, kind: input, shape index: {}]   ;;  %s3593_s17 = inlined_call_operand.vmem [shape: f32[1,128], index: 17, kind: input, shape index: {}]   ;;  %s3594_s18 = inlined_call_operand.vmem [shape: f32[1,128], index: 18, kind: input, shape index: {}]   ;;  %s3595_s19 = inlined_call_operand.vmem [shape: f32[1,128], index: 19, kind: input, shape index: {}]   ;;  %s3596_s20 = inlined_call_operand.vmem [shape: f32[1,128], index: 20, kind: input, shape index: {}]   ;;  %s3597_s21 = inlined_call_operand.vmem [shape: f32[1,128], index: 21, kind: input, shape index: {}]   ;;  %s3598_s22 = inlined_call_operand.hbm [shape: bf16[128,256], index: 22, kind: input, shape index: {}]   ;;  %s3599_s23 = inlined_call_operand.vmem [shape: f32[1,256], index: 23, kind: input, shape index: {}]   ;;  %s3600_s24 = inlined_call_operand.hbm [shape: f32[40,128], index: 24, kind: output, shape index: {}]  }
   0x1   :  { %3605 = sst [smem:[#allocation23_spill]] %s3576_s0 }
   0x2   :  { %3606 = sst [smem:[#allocation24_spill]] %s3577_s1 }
   0x3   :  { %3607 = sst [smem:[#allocation25_spill]] %s3578_s2 }
   0x4   :  { %3608 = sst [smem:[#allocation26_spill]] %s3579_s3 }
   0x5   :  { %3609 = sst [smem:[#allocation27_spill]] %s3580_s4 }
   0x6   :  { %3610 = sst [smem:[#allocation28_spill]] %s3581_s5 }
   0x7   :  { %3611 = sst [smem:[#allocation29_spill]] %s3582_s6 }
   0x8   :  { %3612 = sst [smem:[#allocation30_spill]] %s3583_s7 }
   0x9   :  { %3613 = sst [smem:[#allocation31_spill]] %s3584_s8 }
   0xa   :  { %3614 = sst [smem:[#allocation32_spill]] %s3600_s24 }
   0xb   :  { %29 = vsyncpa [#allocation3], 0 }
   0xc   :  { %30 = vsyncpa [#allocation6], 0 }
   0xd   :  { %31 = vsyncpa [#allocation9], 0 }
   0xe   :  { %32 = vsyncpa [#allocation12], 0 }
   0xf   :  { %33 = vsyncpa [#allocation15], 0 }
  0x10   :  { %34 = vsyncpa [#allocation4], 0  ;;  %s2983_s5 = smov [#allocation5]  }
  0x11   :  { %s52_s26 = sshll.u32 %s2983_s5, 4  ;;  %s53_s26 = int_to_ptr.vmem [resolvable:$true] %s52_s26 }
  0x12   :  { %s2799_s27 = scalar_lea.vmem %s53_s26, 640  ;;  %p2804_p1 = scmp.lt.s32.totalorder %s53_s26, %s53_s26 }
  0x13   :  { %p2800_p0 = scmp.ne.s32.totalorder %s53_s26, %s2799_s27  ;;  %p2805_p2 = scmp.lt.s32.totalorder %s2799_s27, %s2799_s27 }
  0x15   :  { %p2806_p3 = por %p2805_p2, %p2804_p1 }
  0x17   :  { %p2807_p4 = pnand %p2806_p3, %p2800_p0 }
  0x19   :  { %2810 = shalt.err (!%p2807_p4)
}
  0x1a   :  { %s3601_s28 = smov 128   ;;  %s3603_s6 = smov 8  }
  0x1b   :  { %s3615_s0 = sld [smem:[#allocation24_spill]]  ;;  %s2986_s7 = smov [#allocation8]  }
  0x1c   :  { %s78_s30 = sshll.u32 %s2986_s7, 4  ;;  %s2987_s3 = smov [#allocation11]   ;;  %s79_s30 = int_to_ptr.vmem [resolvable:$true] %s78_s30 }
  0x1d   :  { %s106_s25 = sshll.u32 %s2987_s3, 4  ;;  %s2819_s8 = scalar_lea.vmem %s79_s30, 1024  ;;  %s107_s25 = int_to_ptr.vmem [resolvable:$true] %s106_s25 }
  0x1e   :  { %p2820_p5 = scmp.ne.s32.totalorder %s79_s30, %s2819_s8  ;;  %p2824_p6 = scmp.lt.s32.totalorder %s79_s30, %s79_s30 }
  0x1f   :  { %p2825_p7 = scmp.lt.s32.totalorder %s2819_s8, %s2819_s8 }
  0x21   :  { %58 = dma.hbm_to_vmem [thread:$0]  %s3615_s0, 640, %s53_s26, [#allocation6], %s3601_s28, %s3601_s28, %s3603_s6  }
  0x22   :  { %p2826_p8 = por %p2825_p7, %p2824_p6 }
  0x24   :  { %p2827_p9 = pnand %p2826_p8, %p2820_p5 }
  0x26   :  { %2830 = shalt.err (!%p2827_p9)
}
  0x27   :  { %s2988_s4 = smov 64   ;;  %s2989_s1 = smov 4  }
  0x28   :  { %s3616_s26 = sld [smem:[#allocation27_spill]]  ;;  %s2839_s2 = scalar_lea.vmem %s107_s25, 1024 }
  0x29   :  { %p2840_p10 = scmp.ne.s32.totalorder %s107_s25, %s2839_s2  ;;  %p2844_p11 = scmp.lt.s32.totalorder %s107_s25, %s107_s25 }
  0x2a   :  { %p2845_p12 = scmp.lt.s32.totalorder %s2839_s2, %s2839_s2 }
  0x2c   :  { %p2846_p13 = por %p2845_p12, %p2844_p11 }
  0x2e   :  { %84 = dma.hbm_to_vmem [thread:$0]  %s3616_s26, 1024, %s79_s30, [#allocation9], %s2988_s4, %s2988_s4, %s2989_s1  }
  0x2f   :  { %p2847_p0 = pnand %p2846_p13, %p2840_p10 }
  0x31   :  { %2850 = shalt.err (!%p2847_p0)
}
  0x32   :  { %s3617_s7 = sld [smem:[#allocation31_spill]]  ;;  %s2990_s3 = smov [#allocation2]  }
  0x33   :  { %s40_s8 = sshll.u32 %s2990_s3, 4  ;;  %s41_s8 = int_to_ptr.vmem [resolvable:$true] %s40_s8 }
  0x34   :  { %s2859_s5 = scalar_lea.vmem %s41_s8, 1920  ;;  %p2864_p2 = scmp.lt.s32.totalorder %s41_s8, %s41_s8 }
  0x35   :  { %p2860_p1 = scmp.ne.s32.totalorder %s41_s8, %s2859_s5  ;;  %p2865_p3 = scmp.lt.s32.totalorder %s2859_s5, %s2859_s5 }
  0x37   :  { %p2866_p4 = por %p2865_p3, %p2864_p2 }
  0x38   :  { %112 = dma.hbm_to_vmem [thread:$0]  %s3617_s7, 1024, %s107_s25, [#allocation12], %s2988_s4, %s2988_s4, %s2989_s1  }
  0x39   :  { %p2867_p5 = pnand %p2866_p4, %p2860_p1 }
  0x3b   :  { %2870 = shalt.err (!%p2867_p5)
}
  0x3c   :  { %s2991_s30 = smov 384   ;;  %s2992_s27 = smov 24  }
  0x3d   :  { %s3618_s28 = sld [smem:[#allocation23_spill]]  ;;  %s2993_s6 = smov [#allocation7]  }
  0x3e   :  { %s64_s24 = sshll.u32 %s2993_s6, 4  ;;  %s2994_s29 = smov [#allocation10]   ;;  %s65_s24 = int_to_ptr.vmem [resolvable:$true] %s64_s24 }
  0x3f   :  { %s92_s25 = sshll.u32 %s2994_s29, 4  ;;  %s2879_s0 = scalar_lea.vmem %s65_s24, 3072  ;;  %s93_s25 = int_to_ptr.vmem [resolvable:$true] %s92_s25 }
  0x40   :  { %p2880_p6 = scmp.ne.s32.totalorder %s65_s24, %s2879_s0  ;;  %p2884_p7 = scmp.lt.s32.totalorder %s65_s24, %s65_s24 }
  0x41   :  { %p2885_p8 = scmp.lt.s32.totalorder %s2879_s0, %s2879_s0 }
  0x43   :  { %46 = dma.hbm_to_vmem [thread:$0]  %s3618_s28, 1920, %s41_s8, [#allocation3], %s2991_s30, %s2991_s30, %s2992_s27  }
  0x44   :  { %p2886_p9 = por %p2885_p8, %p2884_p7 }
  0x46   :  { %p2887_p10 = pnand %p2886_p9, %p2880_p6 }
  0x48   :  { %2890 = shalt.err (!%p2887_p10)
}
  0x49   :  { %s3619_s5 = sld [smem:[#allocation25_spill]]  ;;  %s2899_s28 = scalar_lea.vmem %s93_s25, 1024 }
  0x4a   :  { %p2900_p11 = scmp.ne.s32.totalorder %s93_s25, %s2899_s28  ;;  %p2904_p12 = scmp.lt.s32.totalorder %s93_s25, %s93_s25 }
  0x4b   :  { %p2905_p13 = scmp.lt.s32.totalorder %s2899_s28, %s2899_s28 }
  0x4d   :  { %p2906_p0 = por %p2905_p13, %p2904_p12 }
  0x4f   :  { %70 = dma.hbm_to_vmem [thread:$0]  %s3619_s5, 3072, %s65_s24, [#allocation6], %s2988_s4, %s2988_s4, %s2989_s1  }
  0x50   :  { %p2907_p1 = pnand %p2906_p0, %p2900_p11 }
  0x52   :  { %2910 = shalt.err (!%p2907_p1)
}
  0x53   :  { %s3620_s30 = sld [smem:[#allocation29_spill]]  ;;  %s2995_s27 = smov [#allocation13]  }
  0x54   :  { %s120_s26 = sshll.u32 %s2995_s27, 4  ;;  %s2996_s2 = smov [#allocation14]   ;;  %s121_s26 = int_to_ptr.vmem [resolvable:$true] %s120_s26 }
  0x55   :  { %s154_s29 = sshll.u32 %s2996_s2, 4  ;;  %s2919_s24 = scalar_lea.vmem %s121_s26, 1024  ;;  %s155_s29 = int_to_ptr.vmem [resolvable:$true] %s154_s29 }
  0x56   :  { %p2920_p2 = scmp.ne.s32.totalorder %s121_s26, %s2919_s24  ;;  %p2924_p3 = scmp.lt.s32.totalorder %s121_s26, %s121_s26 }
  0x57   :  { %p2925_p4 = scmp.lt.s32.totalorder %s2919_s24, %s2919_s24 }
  0x59   :  { %98 = dma.hbm_to_vmem [thread:$0]  %s3620_s30, 1024, %s93_s25, [#allocation9], %s2988_s4, %s2988_s4, %s2989_s1  }
  0x5a   :  { %p2926_p5 = por %p2925_p4, %p2924_p3 }
  0x5c   :  { %p2927_p6 = pnand %p2926_p5, %p2920_p2 }
  0x5e   :  { %2930 = shalt.err (!%p2927_p6)
}
  0x5f   :  { %126 = dma.hbm_to_vmem [thread:$0]  %s3586_s10, 1024, %s121_s26, [#allocation12], %s2988_s4, %s2988_s4, %s2989_s1  }
  0x60   :  { %s2939_s25 = scalar_lea.vmem %s155_s29, 2048  ;;  %p2944_p8 = scmp.lt.s32.totalorder %s155_s29, %s155_s29 }
  0x61   :  { %p2940_p7 = scmp.ne.s32.totalorder %s155_s29, %s2939_s25  ;;  %p2945_p9 = scmp.lt.s32.totalorder %s2939_s25, %s2939_s25 }
  0x63   :  { %p2946_p10 = por %p2945_p9, %p2944_p8 }
  0x65   :  { %p2947_p11 = pnand %p2946_p10, %p2940_p7 }
  0x67   :  { %2950 = shalt.err (!%p2947_p11)
}
  0x68   :  { %s3621_s3 = smov 8   ;;  %s3622_s5 = smov 128  }
  0x69   :  { %160 = dma.hbm_to_vmem [thread:$0]  %s3598_s22, 2048, %s155_s29, [#allocation15], %s3622_s5, %s3622_s5, %s3621_s3  }
  0x6a   :  { %2971 = dma.done.wait [#allocation3], 1920  }
  0x6b   :  { %2972 = vsyncadd [#allocation3], 4294965376 }
  0x6c   :  { %2973 = dma.done.wait [#allocation6], 3712  }
  0x6d   :  { %2974 = vsyncadd [#allocation6], 4294963584 }
  0x6e   :  { %2975 = dma.done.wait [#allocation9], 2048  }
  0x6f   :  { %2976 = vsyncadd [#allocation9], 4294965248 }
  0x70   :  { %2977 = dma.done.wait [#allocation12], 2048  }
  0x71   :  { %2978 = vsyncadd [#allocation12], 4294965248 }
  0x72   :  { %2979 = dma.done.wait [#allocation15], 2048  }
  0x73   :  { %2980 = vsyncadd [#allocation15], 4294965248  ;;  %v2997_v0 = vmov 0.0   ;;  %vm2998_vm0 = vmmov 0   ;;  %v2501_v1 = vld [vmem:[#allocation7 + $0x78] sm:$0xff]   ;;  %v2504_v4 = vld [vmem:[#allocation7 + $0x70] sm:$0xff]  }
  0x74   :  { %2327 = vmatprep.subr.bf16.mxu1 %v2997_v0  ;;  %2343 = vmatprep.mubr.msk.bf16.mxu1 %vm2998_vm0, %v2997_v0  ;;  %v2502_v2 = vld [vmem:[#allocation7 + $0xb8] sm:$0xff]   ;;  %v2505_v5 = vld [vmem:[#allocation7 + $0xb0] sm:$0xff]   ;;  %v2507_v7 = vld [vmem:[#allocation7 + $0x68] sm:$0xff]   ;;  %s3623_s4 = sld [smem:[#allocation26_spill]] }
  0x75   :  { %2238 = vmatprep.subr.bf16.mxu0 %v2501_v1  ;;  %v2503_v3 = vld [vmem:[#allocation7 + $0x38] sm:$0xff]   ;;  %2328 = vmatpush3.bf16.msra.mxu1 %v2502_v2  ;;  %v2506_v6 = vld [vmem:[#allocation7 + $0x30] sm:$0xff]   ;;  %v2508_v8 = vld [vmem:[#allocation7 + $0xa8] sm:$0xff]   ;;  %s3624_s26 = sld [smem:[#allocation28_spill]] }
  0x76   :  { %2239 = vmatpush3.bf16.msra.mxu0 %v2503_v3  ;;  %2329 = vmatprep.subr.bf16.mxu1 %v2997_v0  ;;  %v2509_v9 = vld [vmem:[#allocation7 + $0x28] sm:$0xff]   ;;  %v2510_v10 = vld [vmem:[#allocation7 + $0x60] sm:$0xff]   ;;  %v2513_v13 = vld [vmem:[#allocation7 + $0x58] sm:$0xff]   ;;  %s3625_s7 = sld [smem:[#allocation30_spill]] }
  0x77   :  { %2240 = vmatprep.subr.bf16.mxu0 %v2504_v4  ;;  %v2511_v11 = vld [vmem:[#allocation7 + $0xa0] sm:$0xff]   ;;  %v2514_v14 = vld [vmem:[#allocation7 + $0x98] sm:$0xff]   ;;  %v2516_v16 = vld [vmem:[#allocation7 + $0x50] sm:$0xff]  }
  0x78   :  { %v2512_v12 = vld [vmem:[#allocation7 + $0x20] sm:$0xff]   ;;  %v2515_v15 = vld [vmem:[#allocation7 + $0x18] sm:$0xff]   ;;  %v2517_v17 = vld [vmem:[#allocation7 + $0x90] sm:$0xff]  }
  0x79   :  { %2330 = vmatpush3.bf16.msra.mxu1 %v2505_v5  ;;  %v2518_v18 = vld [vmem:[#allocation7 + $0x10] sm:$0xff]   ;;  %v2519_v19 = vld [vmem:[#allocation7 + $0x48] sm:$0xff]   ;;  %v2522_v22 = vld [vmem:[#allocation7 + $0x40] sm:$0xff]  }
  0x7a   :  { %2241 = vmatpush3.bf16.msra.mxu0 %v2506_v6  ;;  %2331 = vmatprep.subr.bf16.mxu1 %v2997_v0  ;;  %v2520_v20 = vld [vmem:[#allocation7 + $0x88] sm:$0xff]   ;;  %v192_v24 = vld [vmem:[#allocation2 + $0x20] sm:$0xff]  ;;  %v190_v28 = vld [vmem:[#allocation2 + $0x10] sm:$0xff] }
  0x7b   :  { %2242 = vmatprep.subr.bf16.mxu0 %v2507_v7  ;;  %v2521_v21 = vld [vmem:[#allocation7 + $0x8] sm:$0xff]   ;;  %v212_v26 = vmul.f32 %v192_v24, %v192_v24  ;;  %v188_v29 = vld [vmem:[#allocation2] sm:$0xff]  ;;  %v191_v30 = vld [vmem:[#allocation2 + $0x18] sm:$0xff]  ;;  %v210_v35 = vmul.f32 %v190_v28, %v190_v28 }
  0x7c   :  { %v189_v23 = vld [vmem:[#allocation2 + $0x8] sm:$0xff]  ;;  %v2523_v31 = vld [vmem:[#allocation7 + $0x80] sm:$0xff]   ;;  %v208_v34 = vmul.f32 %v188_v29, %v188_v29  ;;  %v211_v36 = vmul.f32 %v191_v30, %v191_v30  ;;  %v195_v37 = vld [vmem:[#allocation2 + $0x38] sm:$0xff]  ;;  %v253_v47 = vpack.c.bf16 %v191_v30, %v188_v29 }
  0x7d   :  { %2332 = vmatpush3.bf16.msra.mxu1 %v2508_v8  ;;  %v209_v25 = vmul.f32 %v189_v23, %v189_v23  ;;  %v254_v27 = vpack.c.bf16 %v192_v24, %v189_v23  ;;  %v2524_v32 = vld [vmem:[#allocation7] sm:$0xff]   ;;  %v193_v33 = vld [vmem:[#allocation2 + $0x28] sm:$0xff]  ;;  %v198_v38 = vld [vmem:[#allocation2 + $0x50] sm:$0xff]  ;;  %v215_v45 = vmul.f32 %v195_v37, %v195_v37 }
  0x7e   :  { %2243 = vmatpush3.bf16.msra.mxu0 %v2509_v9  ;;  %2333 = vmatprep.subr.bf16.mxu1 %v2997_v0  ;;  %v196_v39 = vld [vmem:[#allocation2 + $0x40] sm:$0xff]  ;;  %v213_v40 = vmul.f32 %v193_v33, %v193_v33  ;;  %v194_v41 = vld [vmem:[#allocation2 + $0x30] sm:$0xff]  ;;  %v197_v42 = vld [vmem:[#allocation2 + $0x48] sm:$0xff]  ;;  %v255_v46 = vpack.c.bf16 %v193_v33, %v190_v28  ;;  %v227_v50 = vadd.f32 %v212_v26, %v211_v36 }
  0x7f   :  { %2244 = vmatprep.subr.bf16.mxu0 %v2510_v10  ;;  %486 = vmatprep.mubr.bf16.mxu0 %v254_v27  ;;  %v200_v43 = vld [vmem:[#allocation2 + $0x60] sm:$0xff]  ;;  %v223_v44 = vadd.f32 %v209_v25, %v208_v34  ;;  %v201_v48 = vld [vmem:[#allocation2 + $0x68] sm:$0xff]  ;;  %v202_v49 = vld [vmem:[#allocation2 + $0x70] sm:$0xff]  ;;  %v214_v53 = vmul.f32 %v194_v41, %v194_v41  ;;  %v216_v54 = vmul.f32 %v196_v39, %v196_v39 }
  0x80   :  { %v199_v51 = vld [vmem:[#allocation2 + $0x58] sm:$0xff]  ;;  %v217_v55 = vmul.f32 %v197_v42, %v197_v42  ;;  %v257_v56 = vpack.c.bf16 %v198_v38, %v195_v37  ;;  %v228_v57 = vadd.f32 %v227_v50, %v213_v40  ;;  %v218_v58 = vmul.f32 %v198_v38, %v198_v38 }
  0x81   :  { %2334 = vmatpush3.bf16.msra.mxu1 %v2511_v11  ;;  %v224_v52 = vadd.f32 %v223_v44, %v210_v35  ;;  %v220_v59 = vmul.f32 %v200_v43, %v200_v43  ;;  %v231_v60 = vadd.f32 %v215_v45, %v214_v53  ;;  %v221_v61 = vmul.f32 %v201_v48, %v201_v48 }
  0x82   :  { %2245 = vmatpush3.bf16.msra.mxu0 %v2512_v12  ;;  %2335 = vmatprep.subr.bf16.mxu1 %v2997_v0  ;;  %v222_v62 = vmul.f32 %v202_v49, %v202_v49  ;;  %v219_v63 = vmul.f32 %v199_v51, %v199_v51  ;;  %v235_v1 = vadd.f32 %v218_v58, %v217_v55 }
  0x83   :  { %2246 = vmatprep.subr.bf16.mxu0 %v2513_v13  ;;  %225 = vadd.xlane.f32.xlu0 %v224_v52  ;;  %v232_v2 = vadd.f32 %v231_v60, %v216_v54  ;;  %v239_v3 = vadd.f32 %v221_v61, %v220_v59  ;;  %v258_v6 = vpack.c.bf16 %v199_v51, %v196_v39 }
  0x84   :  { %v236_v5 = vadd.f32 %v235_v1, %v219_v63  ;;  %v256_v7 = vpack.c.bf16 %v197_v42, %v194_v41  ;;  %v260_v8 = vpack.c.bf16 %v201_v48, %v201_v48  ;;  %v261_v9 = vpack.c.bf16 %v202_v49, %v202_v49 }
  0x85   :  { %2336 = vmatpush3.bf16.msra.mxu1 %v2514_v14  ;;  %v240_v4 = vadd.f32 %v239_v3, %v222_v62  ;;  %233 = vadd.xlane.f32.xlu1 %v232_v2  ;;  %v259_v10 = vpack.c.bf16 %v200_v43, %v200_v43 }
  0x86   :  { %2247 = vmatpush3.bf16.msra.mxu0 %v2515_v15  ;;  %2337 = vmatprep.subr.bf16.mxu1 %v2997_v0 }
  0x87   :  { %2248 = vmatprep.subr.bf16.mxu0 %v2516_v16  ;;  %229 = vadd.xlane.f32.xlu0 %v228_v57 }
  0x89   :  { %2338 = vmatpush3.bf16.msra.mxu1 %v2517_v17  ;;  %237 = vadd.xlane.f32.xlu1 %v236_v5 }
  0x8a   :  { %2249 = vmatpush3.bf16.msra.mxu0 %v2518_v18  ;;  %2339 = vmatprep.subr.bf16.mxu1 %v2997_v0 }
  0x8b   :  { %2250 = vmatprep.subr.bf16.mxu0 %v2519_v19  ;;  %241 = vadd.xlane.f32.xlu0 %v240_v4 }
  0x8d   :  { %2340 = vmatpush3.bf16.msra.mxu1 %v2520_v20 }
  0x8e   :  { %2251 = vmatpush3.bf16.msra.mxu0 %v2521_v21  ;;  %2341 = vmatprep.subr.bf16.mxu1 %v2997_v0 }
  0x8f   :  { %2252 = vmatprep.subr.bf16.mxu0 %v2522_v22 }
  0x91   :  { %2342 = vmatpush3.bf16.msra.mxu1 %v2523_v31 }
  0x92   :  { %2253 = vmatpush3.bf16.msra.mxu0 %v2524_v32  ;;  %2383 = vmatprep.subr.bf16.mxu1 %v2997_v0  ;;  %v2150_v32 = vld [vmem:[%s3623_s4] ss:$0 sm:$0xff] }
  0x93   :  { %2355 = vmatprep.subr.bf16.mxu0 %v2997_v0 }
  0x94   :  { %2344 = vmatmul.mubr.bf16.vlgmr.msra.gmra.mxu1 %v255_v46 }
  0x95   :  { %487 = vmatmul.mubr.bf16.vlgmr.msra.gmra.mxu0 %v253_v47  ;;  %2347 = vmatprep.mubr.msk.bf16.mxu1 %vm2998_vm0, %v2997_v0 }
  0x96   :  { %494 = vmatprep.mubr.bf16.mxu0 %v257_v56 }
  0x9c   :  { %2348 = vmatmul.mubr.bf16.gmra.mxu1 %v258_v6 }
  0x9d   :  { %495 = vmatmul.mubr.bf16.gmra.mxu0 %v256_v7  ;;  %2351 = vmatprep.mubr.msk.bf16.mxu1 %vm2998_vm0, %v2997_v0 }
  0x9e   :  { %502 = vmatprep.mubr.bf16.mxu0 %v260_v8 }
  0xa4   :  { %2352 = vmatmul.mubr.bf16.gmra.mxu1 %v261_v9 }
  0xa5   :  { %503 = vmatmul.mubr.bf16.gmra.mxu0 %v259_v10  ;;  %2399 = vmatprep.mubr.msk.bf16.mxu1 %vm2998_vm0, %v2997_v0 }
  0xa6   :  { %2371 = vmatprep.mubr.msk.bf16.mxu0 %vm2998_vm0, %v2997_v0 }
 0x10c   :  { %v226_v11 = vpop.xlane.xlu0 %225 }
 0x10d   :  { %v243_v12 = vmax.f32 %v226_v11, 1e-24 }
 0x10e   :  { %v234_v14 = vpop.xlane.xlu1 %233 }
 0x10f   :  { %2581 = vrsqrt.f32 %v243_v12  ;;  %v245_v16 = vmax.f32 %v234_v14, 1e-24 }
 0x110   :  { %v230_v13 = vpop.xlane.xlu0 %229 }
 0x111   :  { %v244_v15 = vmax.f32 %v230_v13, 1e-24 }
 0x112   :  { %v238_v17 = vpop.xlane.xlu1 %237 }
 0x113   :  { %2583 = vrsqrt.f32 %v244_v15  ;;  %v246_v19 = vmax.f32 %v238_v17, 1e-24 }
 0x114   :  { %2585 = vrsqrt.f32 %v245_v16  ;;  %v242_v21 = vpop.xlane.xlu0 %241 }
 0x115   :  { %2587 = vrsqrt.f32 %v246_v19  ;;  %v247_v26 = vmax.f32 %v242_v21, 1e-24 }
 0x117   :  { %2589 = vrsqrt.f32 %v247_v26 }
 0x11c   :  { %v2582_v27 = vpop.eup %2581 }
 0x120   :  { %v2584_v36 = vpop.eup %2583 }
 0x121   :  { %v2586_v46 = vpop.eup %2585 }
 0x122   :  { %v2588_v56 = vpop.eup %2587 }
 0x124   :  { %v2590_v3 = vpop.eup %2589 }
 0x154   :  { %v544_v18 = vpop.f32.mrf.mxu1 }
 0x155   :  { %v2254_v20 = vpop.f32.mrf.mxu0 }
 0x156   :  { %v2345_v22 = vpop.f32.mrf.mxu1 }
 0x157   :  { %v2255_v23 = vpop.f32.mrf.mxu0 }
 0x158   :  { %v2256_v24 = vadd.f32 %v2255_v23, %v2254_v20  ;;  %v547_v25 = vpop.f32.mrf.mxu1 }
 0x159   :  { %v2257_v28 = vpop.f32.mrf.mxu0 }
 0x15a   :  { %v545_v29 = vadd.f32 %v2256_v24, %v544_v18  ;;  %v2346_v30 = vpop.f32.mrf.mxu1 }
 0x15b   :  { %v2258_v31 = vpop.f32.mrf.mxu0 }
 0x15c   :  { %v566_v33 = vmul.f32 %v2582_v27, %v545_v29  ;;  %v2259_v34 = vadd.f32 %v2258_v31, %v2257_v28  ;;  %v552_v35 = vpop.f32.mrf.mxu1 }
 0x15d   :  { %v2260_v37 = vpop.f32.mrf.mxu0 }
 0x15e   :  { %v548_v38 = vadd.f32 %v2259_v34, %v547_v25  ;;  %v2349_v39 = vpop.f32.mrf.mxu1  ;;  %v578_v40 = vadd.f32 %v2150_v32, %v566_v33 }
 0x15f   :  { %v2261_v41 = vpop.f32.mrf.mxu0  ;;  %v2526_v39 = vld [vmem:[#allocation8 + $0x30] sm:$0xff]  }
 0x160   :  { %v567_v42 = vmul.f32 %v2584_v36, %v548_v38  ;;  %v2262_v43 = vadd.f32 %v2261_v41, %v2260_v37  ;;  %v555_v44 = vpop.f32.mrf.mxu1  ;;  %v2151_v45 = vmul.f32 -1.442695, %v578_v40  ;;  %v2525_v37 = vld [vmem:[#allocation8 + $0x38] sm:$0xff]   ;;  %v2528_v41 = vld [vmem:[#allocation8 + $0x20] sm:$0xff]  }
 0x161   :  { %v2263_v47 = vpop.f32.mrf.mxu0  ;;  %2356 = vmatpush3.bf16.msra.mxu0 %v2525_v37 }
 0x162   :  { %v553_v48 = vadd.f32 %v2262_v43, %v552_v35  ;;  %v2350_v49 = vpop.f32.mrf.mxu1  ;;  %2591 = vpow2.f32 %v2151_v45  ;;  %v579_v50 = vadd.f32 %v2150_v32, %v567_v42  ;;  %2357 = vmatprep.subr.bf16.mxu0 %v2997_v0  ;;  %v2529_v42 = vld [vmem:[#allocation8 + $0x18] sm:$0xff]   ;;  %v2530_v43 = vld [vmem:[#allocation8 + $0x10] sm:$0xff]   ;;  %v2532_v45 = vld [vmem:[#allocation8] sm:$0xff]  }
 0x163   :  { %v2264_v51 = vpop.f32.mrf.mxu0 }
 0x164   :  { %v568_v52 = vmul.f32 %v2586_v46, %v553_v48  ;;  %v2265_v53 = vadd.f32 %v2264_v51, %v2263_v47  ;;  %v560_v54 = vpop.f32.mrf.mxu1  ;;  %v2152_v55 = vmul.f32 -1.442695, %v579_v50 }
 0x165   :  { %v2266_v57 = vpop.f32.mrf.mxu0  ;;  %2358 = vmatpush3.bf16.msra.mxu0 %v2526_v39 }
 0x166   :  { %v556_v58 = vadd.f32 %v2265_v53, %v555_v44  ;;  %v2353_v59 = vpop.f32.mrf.mxu1  ;;  %2593 = vpow2.f32 %v2152_v55  ;;  %v580_v60 = vadd.f32 %v2150_v32, %v568_v52  ;;  %2359 = vmatprep.subr.bf16.mxu0 %v2997_v0  ;;  %v2531_v44 = vld [vmem:[#allocation8 + $0x8] sm:$0xff]  }
 0x167   :  { %v2267_v61 = vpop.f32.mrf.mxu0 }
 0x168   :  { %v569_v62 = vmul.f32 %v2588_v56, %v556_v58  ;;  %v2268_v63 = vadd.f32 %v2267_v61, %v2266_v57  ;;  %v563_v1 = vpop.f32.mrf.mxu1  ;;  %v2153_v2 = vmul.f32 -1.442695, %v580_v60 }
 0x169   :  { %v2269_v4 = vpop.f32.mrf.mxu0 }
 0x16a   :  { %v561_v5 = vadd.f32 %v2268_v63, %v560_v54  ;;  %v2354_v6 = vpop.f32.mrf.mxu1  ;;  %2595 = vpow2.f32 %v2153_v2  ;;  %v581_v7 = vadd.f32 %v2150_v32, %v569_v62 }
 0x16b   :  { %v2270_v8 = vpop.f32.mrf.mxu0 }
 0x16c   :  { %v570_v9 = vmul.f32 %v2590_v3, %v561_v5  ;;  %v2154_v10 = vmul.f32 -1.442695, %v581_v7 }
 0x16e   :  { %v582_v11 = vadd.f32 %v2150_v32, %v570_v9  ;;  %2597 = vpow2.f32 %v2154_v10 }
 0x16f   :  { %v2592_v12 = vpop.eup %2591 }
 0x170   :  { %v2155_v13 = vmul.f32 -1.442695, %v582_v11  ;;  %v598_v14 = vadd.f32 1.0, %v2592_v12 }
 0x172   :  { %2599 = vpow2.f32 %v2155_v13 }
 0x173   :  { %v2594_v15 = vpop.eup %2593  ;;  %2601 = vrcp.f32 %v598_v14 }
 0x174   :  { %v599_v16 = vadd.f32 1.0, %v2594_v15 }
 0x176   :  { %2603 = vrcp.f32 %v599_v16 }
 0x177   :  { %v2596_v17 = vpop.eup %2595 }
 0x178   :  { %v600_v18 = vadd.f32 1.0, %v2596_v17 }
 0x17a   :  { %2605 = vrcp.f32 %v600_v18 }
 0x17b   :  { %v2598_v19 = vpop.eup %2597 }
 0x17c   :  { %v601_v20 = vadd.f32 1.0, %v2598_v19 }
 0x17e   :  { %2607 = vrcp.f32 %v601_v20 }
 0x17f   :  { %v2600_v21 = vpop.eup %2599 }
 0x180   :  { %v2602_v22 = vpop.eup %2601  ;;  %v602_v23 = vadd.f32 1.0, %v2600_v21  ;;  %v2156_v21 = vld [vmem:[%s3588_s12] ss:$0 sm:$0xff] }
 0x181   :  { %v3194_v24 = vmul.f32 %v2602_v22, %v578_v40  ;;  %v2527_v40 = vld [vmem:[#allocation8 + $0x28] sm:$0xff]  }
 0x182   :  { %2609 = vrcp.f32 %v602_v23  ;;  %2360 = vmatpush3.bf16.msra.mxu0 %v2527_v40 }
 0x183   :  { %v2604_v25 = vpop.eup %2603  ;;  %618 = vadd.xlane.f32.xlu1 %v3194_v24  ;;  %v633_v27 = vmul.f32 %v3194_v24, %v3194_v24  ;;  %2361 = vmatprep.subr.bf16.mxu0 %v2997_v0 }
 0x184   :  { %v3197_v26 = vmul.f32 %v2604_v25, %v579_v50 }
 0x186   :  { %620 = vadd.xlane.f32.xlu0 %v3197_v26  ;;  %v634_v30 = vmul.f32 %v3197_v26, %v3197_v26  ;;  %2362 = vmatpush3.bf16.msra.mxu0 %v2528_v41 }
 0x187   :  { %v2606_v28 = vpop.eup %2605  ;;  %638 = vadd.xlane.f32.xlu1 %v633_v27  ;;  %2363 = vmatprep.subr.bf16.mxu0 %v2997_v0 }
 0x188   :  { %v3202_v29 = vmul.f32 %v2606_v28, %v580_v60  ;;  %v2157_v28 = vld [vmem:[%s3589_s13] ss:$0 sm:$0xff] }
 0x18a   :  { %640 = vadd.xlane.f32.xlu0 %v634_v30  ;;  %v635_v33 = vmul.f32 %v3202_v29, %v3202_v29  ;;  %2364 = vmatpush3.bf16.msra.mxu0 %v2529_v42 }
 0x18b   :  { %v2608_v31 = vpop.eup %2607  ;;  %622 = vadd.xlane.f32.xlu1 %v3202_v29  ;;  %2365 = vmatprep.subr.bf16.mxu0 %v2997_v0 }
 0x18c   :  { %v3207_v32 = vmul.f32 %v2608_v31, %v581_v7 }
 0x18e   :  { %624 = vadd.xlane.f32.xlu0 %v3207_v32  ;;  %v636_v35 = vmul.f32 %v3207_v32, %v3207_v32  ;;  %2366 = vmatpush3.bf16.msra.mxu0 %v2530_v43 }
 0x18f   :  { %v2610_v34 = vpop.eup %2609  ;;  %642 = vadd.xlane.f32.xlu1 %v635_v33  ;;  %2367 = vmatprep.subr.bf16.mxu0 %v2997_v0 }
 0x190   :  { %v3214_v36 = vmul.f32 %v2610_v34, %v582_v11 }
 0x192   :  { %644 = vadd.xlane.f32.xlu0 %v636_v35  ;;  %v637_v38 = vmul.f32 %v3214_v36, %v3214_v36  ;;  %2368 = vmatpush3.bf16.msra.mxu0 %v2531_v44 }
 0x193   :  { %626 = vadd.xlane.f32.xlu1 %v3214_v36  ;;  %2369 = vmatprep.subr.bf16.mxu0 %v2997_v0 }
 0x196   :  { %646 = vadd.xlane.f32.xlu0 %v637_v38  ;;  %2370 = vmatpush3.bf16.msra.mxu0 %v2532_v45 }
 0x197   :  { %2411 = vmatprep.subr.bf16.mxu0 %v2997_v0 }
 0x20c   :  { %v619_v46 = vpop.xlane.xlu1 %618 }
 0x20d   :  { %v628_v47 = vmul.f32 0.0078125, %v619_v46 }
 0x20f   :  { %v621_v48 = vpop.xlane.xlu0 %620  ;;  %v653_v51 = vmul.f32 %v628_v47, %v628_v47  ;;  %v663_v17 = vsub.f32 %v3194_v24, %v628_v47 }
 0x210   :  { %v639_v49 = vpop.xlane.xlu1 %638  ;;  %v629_v50 = vmul.f32 0.0078125, %v621_v48  ;;  %v2158_v48 = vld [vmem:[%s3624_s26] ss:$0 sm:$0xff] }
 0x211   :  { %v648_v52 = vmul.f32 0.0078125, %v639_v49 }
 0x212   :  { %v654_v55 = vmul.f32 %v629_v50, %v629_v50  ;;  %v664_v22 = vsub.f32 %v3197_v26, %v629_v50 }
 0x213   :  { %v658_v53 = vsub.f32 %v648_v52, %v653_v51  ;;  %v641_v54 = vpop.xlane.xlu0 %640 }
 0x214   :  { %v623_v56 = vpop.xlane.xlu1 %622  ;;  %v649_v57 = vmul.f32 0.0078125, %v641_v54 }
 0x215   :  { %v668_v58 = vadd.f32 0.1, %v658_v53  ;;  %v630_v59 = vmul.f32 0.0078125, %v623_v56 }
 0x216   :  { %v659_v60 = vsub.f32 %v649_v57, %v654_v55 }
 0x217   :  { %2611 = vrsqrt.f32 %v668_v58  ;;  %v625_v61 = vpop.xlane.xlu0 %624  ;;  %v655_v2 = vmul.f32 %v630_v59, %v630_v59  ;;  %v665_v24 = vsub.f32 %v3202_v29, %v630_v59 }
 0x218   :  { %v669_v62 = vadd.f32 0.1, %v659_v60  ;;  %v643_v63 = vpop.xlane.xlu1 %642  ;;  %v631_v1 = vmul.f32 0.0078125, %v625_v61 }
 0x219   :  { %v650_v3 = vmul.f32 0.0078125, %v643_v63 }
 0x21a   :  { %2613 = vrsqrt.f32 %v669_v62  ;;  %v656_v6 = vmul.f32 %v631_v1, %v631_v1  ;;  %v666_v37 = vsub.f32 %v3207_v32, %v631_v1 }
 0x21b   :  { %v660_v4 = vsub.f32 %v650_v3, %v655_v2  ;;  %v645_v5 = vpop.xlane.xlu0 %644 }
 0x21c   :  { %v627_v7 = vpop.xlane.xlu1 %626  ;;  %v651_v8 = vmul.f32 0.0078125, %v645_v5 }
 0x21d   :  { %v670_v9 = vadd.f32 0.1, %v660_v4  ;;  %v632_v10 = vmul.f32 0.0078125, %v627_v7 }
 0x21e   :  { %v661_v11 = vsub.f32 %v651_v8, %v656_v6 }
 0x21f   :  { %2615 = vrsqrt.f32 %v670_v9  ;;  %v647_v12 = vpop.xlane.xlu0 %646  ;;  %v657_v13 = vmul.f32 %v632_v10, %v632_v10  ;;  %v667_v29 = vsub.f32 %v3214_v36, %v632_v10 }
 0x220   :  { %v671_v14 = vadd.f32 0.1, %v661_v11  ;;  %v652_v15 = vmul.f32 0.0078125, %v647_v12 }
 0x222   :  { %2617 = vrsqrt.f32 %v671_v14  ;;  %v662_v16 = vsub.f32 %v652_v15, %v657_v13 }
 0x224   :  { %v2612_v18 = vpop.eup %2611  ;;  %v672_v19 = vadd.f32 0.1, %v662_v16 }
 0x225   :  { %v678_v20 = vmul.f32 %v2612_v18, %v663_v17 }
 0x226   :  { %2619 = vrsqrt.f32 %v672_v19 }
 0x227   :  { %v2614_v23 = vpop.eup %2613  ;;  %v690_v27 = vmul.f32 %v2156_v21, %v678_v20 }
 0x228   :  { %v679_v25 = vmul.f32 %v2614_v23, %v664_v22 }
 0x229   :  { %v3236_v33 = vadd.f32 %v2157_v28, %v690_v27 }
 0x22a   :  { %v691_v30 = vmul.f32 %v2156_v21, %v679_v25 }
 0x22c   :  { %v2616_v31 = vpop.eup %2615  ;;  %v3238_v34 = vadd.f32 %v2157_v28, %v691_v30 }
 0x22d   :  { %v680_v35 = vmul.f32 %v2616_v31, %v665_v24 }
 0x22e   :  { %v707_v26 = vpack.c.bf16 %v3238_v34, %v3236_v33 }
 0x22f   :  { %v2618_v38 = vpop.eup %2617  ;;  %v692_v40 = vmul.f32 %v2156_v21, %v680_v35 }
 0x230   :  { %2372 = vmatmul.mubr.bf16.vlgmr.msra.gmra.mxu0 %v707_v26  ;;  %v681_v39 = vmul.f32 %v2618_v38, %v666_v37 }
 0x231   :  { %2375 = vmatprep.mubr.msk.bf16.mxu0 %vm2998_vm0, %v2997_v0  ;;  %v3246_v43 = vadd.f32 %v2157_v28, %v692_v40 }
 0x232   :  { %v693_v41 = vmul.f32 %v2156_v21, %v681_v39 }
 0x233   :  { %v2620_v42 = vpop.eup %2619 }
 0x234   :  { %v3248_v44 = vadd.f32 %v2157_v28, %v693_v41  ;;  %v682_v45 = vmul.f32 %v2620_v42, %v667_v29  ;;  %v2533_v29 = vld [vmem:[#allocation10 + $0x38] sm:$0xff]  }
 0x235   :  { %2384 = vmatpush3.bf16.msra.mxu1 %v2533_v29 }
 0x236   :  { %v708_v32 = vpack.c.bf16 %v3248_v44, %v3246_v43  ;;  %v694_v46 = vmul.f32 %v2156_v21, %v682_v45  ;;  %2385 = vmatprep.subr.bf16.mxu1 %v2997_v0  ;;  %v2534_v45 = vld [vmem:[#allocation10 + $0x30] sm:$0xff]  }
 0x238   :  { %2376 = vmatmul.mubr.bf16.gmra.mxu0 %v708_v32  ;;  %v3254_v47 = vadd.f32 %v2157_v28, %v694_v46  ;;  %v2535_v32 = vld [vmem:[#allocation10 + $0x28] sm:$0xff]   ;;  %v2536_v46 = vld [vmem:[#allocation10 + $0x20] sm:$0xff]  }
 0x239   :  { %2379 = vmatprep.mubr.msk.bf16.mxu0 %vm2998_vm0, %v2997_v0  ;;  %2386 = vmatpush3.bf16.msra.mxu1 %v2534_v45 }
 0x23a   :  { %v709_v36 = vpack.c.bf16 %v3254_v47, %v3254_v47  ;;  %2387 = vmatprep.subr.bf16.mxu1 %v2997_v0 }
 0x23d   :  { %2388 = vmatpush3.bf16.msra.mxu1 %v2535_v32 }
 0x23e   :  { %2389 = vmatprep.subr.bf16.mxu1 %v2997_v0 }
 0x240   :  { %2380 = vmatmul.mubr.bf16.gmra.mxu0 %v709_v36  ;;  %v2537_v36 = vld [vmem:[#allocation10 + $0x18] sm:$0xff]  }
 0x241   :  { %2427 = vmatprep.mubr.msk.bf16.mxu0 %vm2998_vm0, %v2997_v0  ;;  %2390 = vmatpush3.bf16.msra.mxu1 %v2536_v46 }
 0x242   :  { %2391 = vmatprep.subr.bf16.mxu1 %v2997_v0 }
 0x245   :  { %2392 = vmatpush3.bf16.msra.mxu1 %v2537_v36 }
 0x246   :  { %2393 = vmatprep.subr.bf16.mxu1 %v2997_v0 }
 0x2f0   :  { %v815_v49 = vpop.f32.mrf.mxu0 }
 0x2f1   :  { %v816_v50 = vadd.f32 %v2158_v48, %v815_v49  ;;  %v2539_v49 = vld [vmem:[#allocation10 + $0x8] sm:$0xff]  }
 0x2f2   :  { %v2373_v51 = vpop.f32.mrf.mxu0 }
 0x2f3   :  { %v837_v52 = vadd.f32 %v816_v50, %v3236_v33  ;;  %v2540_v50 = vld [vmem:[#allocation10] sm:$0xff]  }
 0x2f4   :  { %v818_v53 = vpop.f32.mrf.mxu0 }
 0x2f5   :  { %v2167_v54 = vmul.f32 -1.442695, %v837_v52  ;;  %v819_v55 = vadd.f32 %v2158_v48, %v818_v53 }
 0x2f6   :  { %v2374_v56 = vpop.f32.mrf.mxu0 }
 0x2f7   :  { %2621 = vpow2.f32 %v2167_v54  ;;  %v838_v57 = vadd.f32 %v819_v55, %v3238_v34 }
 0x2f8   :  { %v823_v58 = vpop.f32.mrf.mxu0 }
 0x2f9   :  { %v2168_v59 = vmul.f32 -1.442695, %v838_v57  ;;  %v824_v60 = vadd.f32 %v2158_v48, %v823_v58 }
 0x2fa   :  { %v2377_v61 = vpop.f32.mrf.mxu0 }
 0x2fb   :  { %2623 = vpow2.f32 %v2168_v59  ;;  %v839_v62 = vadd.f32 %v824_v60, %v3246_v43 }
 0x2fc   :  { %v826_v63 = vpop.f32.mrf.mxu0 }
 0x2fd   :  { %v2169_v1 = vmul.f32 -1.442695, %v839_v62  ;;  %v827_v2 = vadd.f32 %v2158_v48, %v826_v63 }
 0x2fe   :  { %v2378_v3 = vpop.f32.mrf.mxu0 }
 0x2ff   :  { %2625 = vpow2.f32 %v2169_v1  ;;  %v840_v4 = vadd.f32 %v827_v2, %v3248_v44 }
 0x300   :  { %v831_v5 = vpop.f32.mrf.mxu0 }
 0x301   :  { %v2170_v6 = vmul.f32 -1.442695, %v840_v4  ;;  %v832_v7 = vadd.f32 %v2158_v48, %v831_v5  ;;  %v2538_v48 = vld [vmem:[#allocation10 + $0x10] sm:$0xff]  }
 0x302   :  { %v2381_v8 = vpop.f32.mrf.mxu0  ;;  %2394 = vmatpush3.bf16.msra.mxu1 %v2538_v48 }
 0x303   :  { %2627 = vpow2.f32 %v2170_v6  ;;  %v841_v9 = vadd.f32 %v832_v7, %v3254_v47  ;;  %2395 = vmatprep.subr.bf16.mxu1 %v2997_v0 }
 0x304   :  { %v2622_v10 = vpop.eup %2621  ;;  %v834_v11 = vpop.f32.mrf.mxu0 }
 0x305   :  { %v857_v12 = vadd.f32 1.0, %v2622_v10  ;;  %v2171_v13 = vmul.f32 -1.442695, %v841_v9 }
 0x306   :  { %v2382_v14 = vpop.f32.mrf.mxu0  ;;  %2396 = vmatpush3.bf16.msra.mxu1 %v2539_v49 }
 0x307   :  { %2629 = vrcp.f32 %v857_v12  ;;  %2397 = vmatprep.subr.bf16.mxu1 %v2997_v0 }
 0x308   :  { %v2624_v15 = vpop.eup %2623  ;;  %2631 = vpow2.f32 %v2171_v13 }
 0x309   :  { %v858_v16 = vadd.f32 1.0, %v2624_v15 }
 0x30a   :  { %2398 = vmatpush3.bf16.msra.mxu1 %v2540_v50 }
 0x30b   :  { %2633 = vrcp.f32 %v858_v16  ;;  %2439 = vmatprep.subr.bf16.mxu1 %v2997_v0 }
 0x30c   :  { %v2626_v17 = vpop.eup %2625 }
 0x30d   :  { %v859_v18 = vadd.f32 1.0, %v2626_v17 }
 0x30f   :  { %2635 = vrcp.f32 %v859_v18 }
 0x310   :  { %v2628_v19 = vpop.eup %2627 }
 0x311   :  { %v860_v20 = vadd.f32 1.0, %v2628_v19 }
 0x313   :  { %2637 = vrcp.f32 %v860_v20 }
 0x314   :  { %v2630_v21 = vpop.eup %2629 }
 0x315   :  { %v2632_v22 = vpop.eup %2631  ;;  %v3268_v23 = vmul.f32 %v2630_v21, %v837_v52 }
 0x316   :  { %v861_v25 = vadd.f32 1.0, %v2632_v22 }
 0x317   :  { %877 = vadd.xlane.f32.xlu1 %v3268_v23  ;;  %v892_v28 = vmul.f32 %v3268_v23, %v3268_v23 }
 0x318   :  { %v2634_v27 = vpop.eup %2633  ;;  %2639 = vrcp.f32 %v861_v25 }
 0x319   :  { %v3273_v30 = vmul.f32 %v2634_v27, %v838_v57 }
 0x31b   :  { %897 = vadd.xlane.f32.xlu1 %v892_v28  ;;  %879 = vadd.xlane.f32.xlu0 %v3273_v30  ;;  %v893_v31 = vmul.f32 %v3273_v30, %v3273_v30 }
 0x31c   :  { %v2636_v24 = vpop.eup %2635 }
 0x31d   :  { %v3278_v35 = vmul.f32 %v2636_v24, %v839_v62  ;;  %v2172_v24 = vld [vmem:[%s3590_s14] ss:$0 sm:$0xff] }
 0x31f   :  { %899 = vadd.xlane.f32.xlu0 %v893_v31  ;;  %881 = vadd.xlane.f32.xlu1 %v3278_v35  ;;  %v894_v26 = vmul.f32 %v3278_v35, %v3278_v35 }
 0x320   :  { %v2638_v37 = vpop.eup %2637 }
 0x321   :  { %v3283_v38 = vmul.f32 %v2638_v37, %v840_v4 }
 0x323   :  { %901 = vadd.xlane.f32.xlu1 %v894_v26  ;;  %883 = vadd.xlane.f32.xlu0 %v3283_v38  ;;  %v895_v40 = vmul.f32 %v3283_v38, %v3283_v38 }
 0x325   :  { %v2640_v39 = vpop.eup %2639 }
 0x326   :  { %v3288_v41 = vmul.f32 %v2640_v39, %v841_v9 }
 0x327   :  { %903 = vadd.xlane.f32.xlu0 %v895_v40  ;;  %v2173_v40 = vld [vmem:[%s3591_s15] ss:$0 sm:$0xff] }
 0x328   :  { %885 = vadd.xlane.f32.xlu1 %v3288_v41  ;;  %v896_v42 = vmul.f32 %v3288_v41, %v3288_v41 }
 0x32b   :  { %905 = vadd.xlane.f32.xlu0 %v896_v42 }
 0x3a0   :  { %v878_v51 = vpop.xlane.xlu1 %877 }
 0x3a1   :  { %v887_v52 = vmul.f32 0.0078125, %v878_v51 }
 0x3a3   :  { %v912_v55 = vmul.f32 %v887_v52, %v887_v52  ;;  %v922_v21 = vsub.f32 %v3268_v23, %v887_v52 }
 0x3a4   :  { %v898_v53 = vpop.xlane.xlu1 %897  ;;  %v880_v54 = vpop.xlane.xlu0 %879 }
 0x3a5   :  { %v907_v56 = vmul.f32 0.0078125, %v898_v53  ;;  %v888_v57 = vmul.f32 0.0078125, %v880_v54 }
 0x3a7   :  { %v917_v58 = vsub.f32 %v907_v56, %v912_v55  ;;  %v913_v62 = vmul.f32 %v888_v57, %v888_v57  ;;  %v923_v31 = vsub.f32 %v3273_v30, %v888_v57 }
 0x3a8   :  { %v882_v59 = vpop.xlane.xlu1 %881  ;;  %v900_v60 = vpop.xlane.xlu0 %899 }
 0x3a9   :  { %v927_v61 = vadd.f32 0.1, %v917_v58  ;;  %v889_v63 = vmul.f32 0.0078125, %v882_v59  ;;  %v908_v1 = vmul.f32 0.0078125, %v900_v60 }
 0x3ab   :  { %2641 = vrsqrt.f32 %v927_v61  ;;  %v918_v2 = vsub.f32 %v908_v1, %v913_v62  ;;  %v914_v5 = vmul.f32 %v889_v63, %v889_v63  ;;  %v924_v23 = vsub.f32 %v3278_v35, %v889_v63 }
 0x3ac   :  { %v902_v3 = vpop.xlane.xlu1 %901  ;;  %v884_v4 = vpop.xlane.xlu0 %883 }
 0x3ad   :  { %v928_v6 = vadd.f32 0.1, %v918_v2  ;;  %v909_v7 = vmul.f32 0.0078125, %v902_v3  ;;  %v890_v8 = vmul.f32 0.0078125, %v884_v4 }
 0x3af   :  { %2643 = vrsqrt.f32 %v928_v6  ;;  %v919_v9 = vsub.f32 %v909_v7, %v914_v5  ;;  %v915_v12 = vmul.f32 %v890_v8, %v890_v8  ;;  %v925_v36 = vsub.f32 %v3283_v38, %v890_v8 }
 0x3b0   :  { %v904_v10 = vpop.xlane.xlu0 %903 }
 0x3b1   :  { %v929_v11 = vadd.f32 0.1, %v919_v9  ;;  %v886_v13 = vpop.xlane.xlu1 %885  ;;  %v910_v14 = vmul.f32 0.0078125, %v904_v10 }
 0x3b2   :  { %v891_v15 = vmul.f32 0.0078125, %v886_v13 }
 0x3b3   :  { %2645 = vrsqrt.f32 %v929_v11  ;;  %v920_v16 = vsub.f32 %v910_v14, %v915_v12 }
 0x3b4   :  { %v906_v17 = vpop.xlane.xlu0 %905  ;;  %v916_v18 = vmul.f32 %v891_v15, %v891_v15  ;;  %v926_v51 = vsub.f32 %v3288_v41, %v891_v15  ;;  %v2174_v41 = vld [vmem:[%s3625_s7] ss:$0 sm:$0xff] }
 0x3b5   :  { %v930_v19 = vadd.f32 0.1, %v920_v16  ;;  %v911_v20 = vmul.f32 0.0078125, %v906_v17 }
 0x3b7   :  { %2647 = vrsqrt.f32 %v930_v19  ;;  %v921_v22 = vsub.f32 %v911_v20, %v916_v18 }
 0x3b8   :  { %v2642_v25 = vpop.eup %2641 }
 0x3b9   :  { %v937_v27 = vmul.f32 %v2642_v25, %v922_v21  ;;  %v931_v28 = vadd.f32 0.1, %v921_v22 }
 0x3bb   :  { %2649 = vrsqrt.f32 %v931_v28  ;;  %v949_v39 = vmul.f32 %v2172_v24, %v937_v27 }
 0x3bc   :  { %v2644_v37 = vpop.eup %2643 }
 0x3bd   :  { %v938_v26 = vmul.f32 %v2644_v37, %v923_v31  ;;  %v961_v45 = vadd.f32 %v2173_v40, %v949_v39 }
 0x3bf   :  { %v950_v29 = vmul.f32 %v2172_v24, %v938_v26  ;;  %v3322_v60 = vadd.f32 %v961_v45, %v3236_v33 }
 0x3c0   :  { %v2646_v42 = vpop.eup %2645 }
 0x3c1   :  { %v962_v32 = vadd.f32 %v2173_v40, %v950_v29  ;;  %v939_v46 = vmul.f32 %v2646_v42, %v924_v23 }
 0x3c3   :  { %v971_v48 = vpack.c.bf16 %v962_v32, %v961_v45  ;;  %v951_v50 = vmul.f32 %v2172_v24, %v939_v46  ;;  %v3326_v3 = vadd.f32 %v962_v32, %v3238_v34 }
 0x3c4   :  { %v2648_v49 = vpop.eup %2647 }
 0x3c5   :  { %2400 = vmatmul.mubr.bf16.vlgmr.msra.gmra.mxu1 %v971_v48  ;;  %v940_v30 = vmul.f32 %v2648_v49, %v925_v36  ;;  %v963_v35 = vadd.f32 %v2173_v40, %v951_v50 }
 0x3c6   :  { %2403 = vmatprep.mubr.msk.bf16.mxu1 %vm2998_vm0, %v2997_v0 }
 0x3c7   :  { %v952_v52 = vmul.f32 %v2172_v24, %v940_v30  ;;  %v3330_v9 = vadd.f32 %v963_v35, %v3246_v43 }
 0x3c8   :  { %v2650_v53 = vpop.eup %2649 }
 0x3c9   :  { %v964_v54 = vadd.f32 %v2173_v40, %v952_v52  ;;  %v941_v55 = vmul.f32 %v2650_v53, %v926_v51 }
 0x3cb   :  { %v972_v56 = vpack.c.bf16 %v964_v54, %v963_v35  ;;  %v953_v57 = vmul.f32 %v2172_v24, %v941_v55  ;;  %v3334_v34 = vadd.f32 %v964_v54, %v3248_v44  ;;  %v2541_v35 = vld [vmem:[#allocation11 + $0x38] sm:$0xff]  }
 0x3cc   :  { %2412 = vmatpush3.bf16.msra.mxu0 %v2541_v35 }
 0x3cd   :  { %2404 = vmatmul.mubr.bf16.gmra.mxu1 %v972_v56  ;;  %v965_v38 = vadd.f32 %v2173_v40, %v953_v57  ;;  %2413 = vmatprep.subr.bf16.mxu0 %v2997_v0  ;;  %v2542_v56 = vld [vmem:[#allocation11 + $0x30] sm:$0xff]   ;;  %v2543_v57 = vld [vmem:[#allocation11 + $0x28] sm:$0xff]  }
 0x3ce   :  { %2407 = vmatprep.mubr.msk.bf16.mxu1 %vm2998_vm0, %v2997_v0 }
 0x3cf   :  { %v973_v58 = vpack.c.bf16 %v965_v38, %v965_v38  ;;  %v3338_v43 = vadd.f32 %v965_v38, %v3254_v47  ;;  %v2544_v38 = vld [vmem:[#allocation11 + $0x20] sm:$0xff]  }
 0x3d0   :  { %2414 = vmatpush3.bf16.msra.mxu0 %v2542_v56 }
 0x3d1   :  { %2415 = vmatprep.subr.bf16.mxu0 %v2997_v0 }
 0x3d4   :  { %2416 = vmatpush3.bf16.msra.mxu0 %v2543_v57 }
 0x3d5   :  { %2408 = vmatmul.mubr.bf16.gmra.mxu1 %v973_v58  ;;  %2417 = vmatprep.subr.bf16.mxu0 %v2997_v0  ;;  %v2545_v58 = vld [vmem:[#allocation11 + $0x18] sm:$0xff]  }
 0x3d6   :  { %2455 = vmatprep.mubr.msk.bf16.mxu1 %vm2998_vm0, %v2997_v0 }
 0x3d8   :  { %2418 = vmatpush3.bf16.msra.mxu0 %v2544_v38 }
 0x3d9   :  { %2419 = vmatprep.subr.bf16.mxu0 %v2997_v0 }
 0x3dc   :  { %2420 = vmatpush3.bf16.msra.mxu0 %v2545_v58 }
 0x3dd   :  { %2421 = vmatprep.subr.bf16.mxu0 %v2997_v0 }
 0x485   :  { %v1079_v59 = vpop.f32.mrf.mxu1 }
 0x486   :  { %v1080_v61 = vadd.f32 %v2174_v41, %v1079_v59  ;;  %v2547_v59 = vld [vmem:[#allocation11 + $0x8] sm:$0xff]  }
 0x487   :  { %v2401_v62 = vpop.f32.mrf.mxu1 }
 0x488   :  { %v1101_v63 = vadd.f32 %v1080_v61, %v3322_v60  ;;  %v2548_v61 = vld [vmem:[#allocation11] sm:$0xff]  }
 0x489   :  { %v1082_v1 = vpop.f32.mrf.mxu1 }
 0x48a   :  { %v2183_v2 = vmul.f32 -1.442695, %v1101_v63  ;;  %v1083_v4 = vadd.f32 %v2174_v41, %v1082_v1 }
 0x48b   :  { %v2402_v5 = vpop.f32.mrf.mxu1 }
 0x48c   :  { %2651 = vpow2.f32 %v2183_v2  ;;  %v1102_v6 = vadd.f32 %v1083_v4, %v3326_v3 }
 0x48d   :  { %v1087_v7 = vpop.f32.mrf.mxu1 }
 0x48e   :  { %v2184_v8 = vmul.f32 -1.442695, %v1102_v6  ;;  %v1088_v33 = vadd.f32 %v2174_v41, %v1087_v7 }
 0x48f   :  { %v2405_v10 = vpop.f32.mrf.mxu1 }
 0x490   :  { %2653 = vpow2.f32 %v2184_v8  ;;  %v1103_v11 = vadd.f32 %v1088_v33, %v3330_v9 }
 0x491   :  { %v1090_v12 = vpop.f32.mrf.mxu1 }
 0x492   :  { %v2185_v13 = vmul.f32 -1.442695, %v1103_v11  ;;  %v1091_v14 = vadd.f32 %v2174_v41, %v1090_v12 }
 0x493   :  { %v2406_v15 = vpop.f32.mrf.mxu1 }
 0x494   :  { %2655 = vpow2.f32 %v2185_v13  ;;  %v1104_v16 = vadd.f32 %v1091_v14, %v3334_v34 }
 0x495   :  { %v1095_v17 = vpop.f32.mrf.mxu1 }
 0x496   :  { %v2186_v18 = vmul.f32 -1.442695, %v1104_v16  ;;  %v1096_v19 = vadd.f32 %v2174_v41, %v1095_v17  ;;  %v2546_v41 = vld [vmem:[#allocation11 + $0x10] sm:$0xff]  }
 0x497   :  { %v2409_v20 = vpop.f32.mrf.mxu1  ;;  %2422 = vmatpush3.bf16.msra.mxu0 %v2546_v41 }
 0x498   :  { %2657 = vpow2.f32 %v2186_v18  ;;  %v1105_v21 = vadd.f32 %v1096_v19, %v3338_v43  ;;  %2423 = vmatprep.subr.bf16.mxu0 %v2997_v0 }
 0x499   :  { %v2652_v22 = vpop.eup %2651  ;;  %v1098_v25 = vpop.f32.mrf.mxu1 }
 0x49a   :  { %v1121_v27 = vadd.f32 1.0, %v2652_v22  ;;  %v2187_v44 = vmul.f32 -1.442695, %v1105_v21 }
 0x49b   :  { %v2410_v28 = vpop.f32.mrf.mxu1  ;;  %2424 = vmatpush3.bf16.msra.mxu0 %v2547_v59 }
 0x49c   :  { %2659 = vrcp.f32 %v1121_v27  ;;  %2425 = vmatprep.subr.bf16.mxu0 %v2997_v0 }
 0x49d   :  { %v2654_v24 = vpop.eup %2653  ;;  %2661 = vpow2.f32 %v2187_v44 }
 0x49e   :  { %v1122_v31 = vadd.f32 1.0, %v2654_v24 }
 0x49f   :  { %2426 = vmatpush3.bf16.msra.mxu0 %v2548_v61 }
 0x4a0   :  { %2663 = vrcp.f32 %v1122_v31 }
 0x4a1   :  { %v2656_v37 = vpop.eup %2655 }
 0x4a2   :  { %v1123_v26 = vadd.f32 1.0, %v2656_v37 }
 0x4a4   :  { %2665 = vrcp.f32 %v1123_v26 }
 0x4a5   :  { %v2658_v47 = vpop.eup %2657 }
 0x4a6   :  { %v1124_v39 = vadd.f32 1.0, %v2658_v47 }
 0x4a8   :  { %2667 = vrcp.f32 %v1124_v39 }
 0x4a9   :  { %v2660_v40 = vpop.eup %2659 }
 0x4aa   :  { %v2662_v23 = vpop.eup %2661  ;;  %v3341_v29 = vmul.f32 %v2660_v40, %v1101_v63 }
 0x4ab   :  { %v1125_v42 = vadd.f32 1.0, %v2662_v23 }
 0x4ac   :  { %1141 = vadd.xlane.f32.xlu1 %v3341_v29  ;;  %v1156_v32 = vmul.f32 %v3341_v29, %v3341_v29 }
 0x4ad   :  { %v2664_v45 = vpop.eup %2663  ;;  %2669 = vrcp.f32 %v1125_v42 }
 0x4ae   :  { %v3346_v46 = vmul.f32 %v2664_v45, %v1102_v6 }
 0x4b0   :  { %1161 = vadd.xlane.f32.xlu1 %v1156_v32  ;;  %1143 = vadd.xlane.f32.xlu0 %v3346_v46  ;;  %v1157_v48 = vmul.f32 %v3346_v46, %v3346_v46 }
 0x4b1   :  { %v2666_v36 = vpop.eup %2665 }
 0x4b2   :  { %v3351_v49 = vmul.f32 %v2666_v36, %v1103_v11  ;;  %v2188_v36 = vld [vmem:[%s3592_s16] ss:$0 sm:$0xff] }
 0x4b4   :  { %1163 = vadd.xlane.f32.xlu0 %v1157_v48  ;;  %1145 = vadd.xlane.f32.xlu1 %v3351_v49  ;;  %v1158_v50 = vmul.f32 %v3351_v49, %v3351_v49 }
 0x4b5   :  { %v2668_v30 = vpop.eup %2667 }
 0x4b6   :  { %v3356_v51 = vmul.f32 %v2668_v30, %v1104_v16 }
 0x4b8   :  { %1165 = vadd.xlane.f32.xlu1 %v1158_v50  ;;  %1147 = vadd.xlane.f32.xlu0 %v3356_v51  ;;  %v1159_v53 = vmul.f32 %v3356_v51, %v3356_v51 }
 0x4ba   :  { %v2670_v52 = vpop.eup %2669 }
 0x4bb   :  { %v3361_v54 = vmul.f32 %v2670_v52, %v1105_v21 }
 0x4bc   :  { %1167 = vadd.xlane.f32.xlu0 %v1159_v53  ;;  %v2189_v53 = vld [vmem:[%s3593_s17] ss:$0 sm:$0xff] }
 0x4bd   :  { %1149 = vadd.xlane.f32.xlu1 %v3361_v54  ;;  %v1160_v55 = vmul.f32 %v3361_v54, %v3361_v54 }
 0x4c0   :  { %1169 = vadd.xlane.f32.xlu0 %v1160_v55 }
 0x535   :  { %v1142_v62 = vpop.xlane.xlu1 %1141 }
 0x536   :  { %v1151_v63 = vmul.f32 0.0078125, %v1142_v62 }
 0x538   :  { %v1176_v4 = vmul.f32 %v1151_v63, %v1151_v63  ;;  %v1186_v40 = vsub.f32 %v3341_v29, %v1151_v63 }
 0x539   :  { %v1162_v1 = vpop.xlane.xlu1 %1161  ;;  %v1144_v2 = vpop.xlane.xlu0 %1143 }
 0x53a   :  { %v1171_v5 = vmul.f32 0.0078125, %v1162_v1  ;;  %v1152_v6 = vmul.f32 0.0078125, %v1144_v2 }
 0x53c   :  { %v1181_v7 = vsub.f32 %v1171_v5, %v1176_v4  ;;  %v1177_v11 = vmul.f32 %v1152_v6, %v1152_v6  ;;  %v1187_v48 = vsub.f32 %v3346_v46, %v1152_v6 }
 0x53d   :  { %v1146_v8 = vpop.xlane.xlu1 %1145  ;;  %v1164_v33 = vpop.xlane.xlu0 %1163 }
 0x53e   :  { %v1191_v10 = vadd.f32 0.1, %v1181_v7  ;;  %v1153_v12 = vmul.f32 0.0078125, %v1146_v8  ;;  %v1172_v13 = vmul.f32 0.0078125, %v1164_v33  ;;  %v2190_v8 = vld [vmem:[%s3585_s9] ss:$0 sm:$0xff] }
 0x540   :  { %2671 = vrsqrt.f32 %v1191_v10  ;;  %v1182_v14 = vsub.f32 %v1172_v13, %v1177_v11  ;;  %v1178_v17 = vmul.f32 %v1153_v12, %v1153_v12  ;;  %v1188_v29 = vsub.f32 %v3351_v49, %v1153_v12 }
 0x541   :  { %v1166_v15 = vpop.xlane.xlu1 %1165  ;;  %v1148_v16 = vpop.xlane.xlu0 %1147 }
 0x542   :  { %v1192_v18 = vadd.f32 0.1, %v1182_v14  ;;  %v1173_v19 = vmul.f32 0.0078125, %v1166_v15  ;;  %v1154_v20 = vmul.f32 0.0078125, %v1148_v16 }
 0x544   :  { %2673 = vrsqrt.f32 %v1192_v18  ;;  %v1183_v21 = vsub.f32 %v1173_v19, %v1178_v17  ;;  %v1179_v27 = vmul.f32 %v1154_v20, %v1154_v20  ;;  %v1189_v58 = vsub.f32 %v3356_v51, %v1154_v20 }
 0x545   :  { %v1168_v22 = vpop.xlane.xlu0 %1167 }
 0x546   :  { %v1193_v25 = vadd.f32 0.1, %v1183_v21  ;;  %v1150_v44 = vpop.xlane.xlu1 %1149  ;;  %v1174_v28 = vmul.f32 0.0078125, %v1168_v22 }
 0x547   :  { %v1155_v24 = vmul.f32 0.0078125, %v1150_v44 }
 0x548   :  { %2675 = vrsqrt.f32 %v1193_v25  ;;  %v1184_v31 = vsub.f32 %v1174_v28, %v1179_v27 }
 0x549   :  { %v1170_v37 = vpop.xlane.xlu0 %1169  ;;  %v1180_v26 = vmul.f32 %v1155_v24, %v1155_v24  ;;  %v1190_v62 = vsub.f32 %v3361_v54, %v1155_v24 }
 0x54a   :  { %v1194_v47 = vadd.f32 0.1, %v1184_v31  ;;  %v1175_v39 = vmul.f32 0.0078125, %v1170_v37 }
 0x54c   :  { %2677 = vrsqrt.f32 %v1194_v47  ;;  %v1185_v23 = vsub.f32 %v1175_v39, %v1180_v26 }
 0x54d   :  { %v2672_v42 = vpop.eup %2671 }
 0x54e   :  { %v1201_v45 = vmul.f32 %v2672_v42, %v1186_v40  ;;  %v1195_v32 = vadd.f32 0.1, %v1185_v23 }
 0x550   :  { %2679 = vrsqrt.f32 %v1195_v32  ;;  %v1213_v52 = vmul.f32 %v2188_v36, %v1201_v45 }
 0x551   :  { %v2674_v30 = vpop.eup %2673 }
 0x552   :  { %v1202_v50 = vmul.f32 %v2674_v30, %v1187_v48  ;;  %v1225_v56 = vadd.f32 %v2189_v53, %v1213_v52 }
 0x554   :  { %v1214_v35 = vmul.f32 %v2188_v36, %v1202_v50  ;;  %v3392_v54 = vadd.f32 %v1225_v56, %v3322_v60 }
 0x555   :  { %v2676_v55 = vpop.eup %2675 }
 0x556   :  { %v1226_v57 = vadd.f32 %v2189_v53, %v1214_v35  ;;  %v1203_v38 = vmul.f32 %v2676_v55, %v1188_v29 }
 0x558   :  { %v1235_v41 = vpack.c.bf16 %v1226_v57, %v1225_v56  ;;  %v1215_v61 = vmul.f32 %v2188_v36, %v1203_v38  ;;  %v3396_v15 = vadd.f32 %v1226_v57, %v3326_v3 }
 0x559   :  { %v2678_v59 = vpop.eup %2677 }
 0x55a   :  { %2428 = vmatmul.mubr.bf16.vlgmr.msra.gmra.mxu0 %v1235_v41  ;;  %v1204_v46 = vmul.f32 %v2678_v59, %v1189_v58  ;;  %v1227_v49 = vadd.f32 %v2189_v53, %v1215_v61 }
 0x55b   :  { %2431 = vmatprep.mubr.msk.bf16.mxu0 %vm2998_vm0, %v2997_v0 }
 0x55c   :  { %v1216_v63 = vmul.f32 %v2188_v36, %v1204_v46  ;;  %v3400_v21 = vadd.f32 %v1227_v49, %v3330_v9 }
 0x55d   :  { %v2680_v1 = vpop.eup %2679 }
 0x55e   :  { %v1228_v2 = vadd.f32 %v2189_v53, %v1216_v63  ;;  %v1205_v4 = vmul.f32 %v2680_v1, %v1190_v62 }
 0x560   :  { %v1236_v5 = vpack.c.bf16 %v1228_v2, %v1227_v49  ;;  %v1217_v6 = vmul.f32 %v2188_v36, %v1205_v4  ;;  %v3404_v3 = vadd.f32 %v1228_v2, %v3334_v34  ;;  %v2549_v49 = vld [vmem:[#allocation13 + $0x38] sm:$0xff]  }
 0x561   :  { %2440 = vmatpush3.bf16.msra.mxu1 %v2549_v49 }
 0x562   :  { %2432 = vmatmul.mubr.bf16.gmra.mxu0 %v1236_v5  ;;  %v1229_v51 = vadd.f32 %v2189_v53, %v1217_v6  ;;  %2441 = vmatprep.subr.bf16.mxu1 %v2997_v0  ;;  %v2550_v5 = vld [vmem:[#allocation13 + $0x30] sm:$0xff]   ;;  %v2551_v6 = vld [vmem:[#allocation13 + $0x28] sm:$0xff]  }
 0x563   :  { %2435 = vmatprep.mubr.msk.bf16.mxu0 %vm2998_vm0, %v2997_v0 }
 0x564   :  { %v1237_v7 = vpack.c.bf16 %v1229_v51, %v1229_v51  ;;  %v3408_v9 = vadd.f32 %v1229_v51, %v3338_v43  ;;  %v2552_v51 = vld [vmem:[#allocation13 + $0x20] sm:$0xff]  }
 0x565   :  { %2442 = vmatpush3.bf16.msra.mxu1 %v2550_v5 }
 0x566   :  { %2443 = vmatprep.subr.bf16.mxu1 %v2997_v0 }
 0x569   :  { %2444 = vmatpush3.bf16.msra.mxu1 %v2551_v6 }
 0x56a   :  { %2436 = vmatmul.mubr.bf16.gmra.mxu0 %v1237_v7  ;;  %2445 = vmatprep.subr.bf16.mxu1 %v2997_v0  ;;  %v2553_v7 = vld [vmem:[#allocation13 + $0x18] sm:$0xff]  }
 0x56d   :  { %2446 = vmatpush3.bf16.msra.mxu1 %v2552_v51 }
 0x56e   :  { %2447 = vmatprep.subr.bf16.mxu1 %v2997_v0 }
 0x571   :  { %2448 = vmatpush3.bf16.msra.mxu1 %v2553_v7 }
 0x572   :  { %2449 = vmatprep.subr.bf16.mxu1 %v2997_v0 }
 0x61a   :  { %v1343_v33 = vpop.f32.mrf.mxu0 }
 0x61b   :  { %v1344_v10 = vadd.f32 %v2190_v8, %v1343_v33  ;;  %v2555_v33 = vld [vmem:[#allocation13 + $0x8] sm:$0xff]  }
 0x61c   :  { %v2429_v11 = vpop.f32.mrf.mxu0 }
 0x61d   :  { %v1365_v12 = vadd.f32 %v1344_v10, %v3392_v54  ;;  %v2556_v10 = vld [vmem:[#allocation13] sm:$0xff]  }
 0x61e   :  { %v1346_v13 = vpop.f32.mrf.mxu0 }
 0x61f   :  { %v2199_v14 = vmul.f32 -1.442695, %v1365_v12  ;;  %v1347_v16 = vadd.f32 %v2190_v8, %v1346_v13 }
 0x620   :  { %v2430_v17 = vpop.f32.mrf.mxu0 }
 0x621   :  { %2681 = vpow2.f32 %v2199_v14  ;;  %v1366_v18 = vadd.f32 %v1347_v16, %v3396_v15 }
 0x622   :  { %v1351_v19 = vpop.f32.mrf.mxu0 }
 0x623   :  { %v2200_v20 = vmul.f32 -1.442695, %v1366_v18  ;;  %v1352_v60 = vadd.f32 %v2190_v8, %v1351_v19 }
 0x624   :  { %v2433_v22 = vpop.f32.mrf.mxu0 }
 0x625   :  { %2683 = vpow2.f32 %v2200_v20  ;;  %v1367_v25 = vadd.f32 %v1352_v60, %v3400_v21 }
 0x626   :  { %v1354_v27 = vpop.f32.mrf.mxu0 }
 0x627   :  { %v2201_v44 = vmul.f32 -1.442695, %v1367_v25  ;;  %v1355_v28 = vadd.f32 %v2190_v8, %v1354_v27 }
 0x628   :  { %v2434_v24 = vpop.f32.mrf.mxu0 }
 0x629   :  { %2685 = vpow2.f32 %v2201_v44  ;;  %v1368_v31 = vadd.f32 %v1355_v28, %v3404_v3 }
 0x62a   :  { %v1359_v37 = vpop.f32.mrf.mxu0 }
 0x62b   :  { %v2202_v26 = vmul.f32 -1.442695, %v1368_v31  ;;  %v1360_v47 = vadd.f32 %v2190_v8, %v1359_v37  ;;  %v2554_v8 = vld [vmem:[#allocation13 + $0x10] sm:$0xff]  }
 0x62c   :  { %v2437_v39 = vpop.f32.mrf.mxu0  ;;  %2450 = vmatpush3.bf16.msra.mxu1 %v2554_v8 }
 0x62d   :  { %2687 = vpow2.f32 %v2202_v26  ;;  %v1369_v40 = vadd.f32 %v1360_v47, %v3408_v9  ;;  %2451 = vmatprep.subr.bf16.mxu1 %v2997_v0 }
 0x62e   :  { %v2682_v23 = vpop.eup %2681  ;;  %v1362_v42 = vpop.f32.mrf.mxu0 }
 0x62f   :  { %v1385_v45 = vadd.f32 1.0, %v2682_v23  ;;  %v2203_v34 = vmul.f32 -1.442695, %v1369_v40 }
 0x630   :  { %v2438_v32 = vpop.f32.mrf.mxu0  ;;  %2452 = vmatpush3.bf16.msra.mxu1 %v2555_v33 }
 0x631   :  { %2689 = vrcp.f32 %v1385_v45  ;;  %2453 = vmatprep.subr.bf16.mxu1 %v2997_v0 }
 0x632   :  { %v2684_v36 = vpop.eup %2683  ;;  %2691 = vpow2.f32 %v2203_v34 }
 0x633   :  { %v1386_v48 = vadd.f32 1.0, %v2684_v36 }
 0x634   :  { %2454 = vmatpush3.bf16.msra.mxu1 %v2556_v10 }
 0x635   :  { %2693 = vrcp.f32 %v1386_v48 }
 0x636   :  { %v2686_v30 = vpop.eup %2685 }
 0x637   :  { %v1387_v50 = vadd.f32 1.0, %v2686_v30 }
 0x639   :  { %2695 = vrcp.f32 %v1387_v50 }
 0x63a   :  { %v2688_v43 = vpop.eup %2687 }
 0x63b   :  { %v1388_v52 = vadd.f32 1.0, %v2688_v43 }
 0x63d   :  { %2697 = vrcp.f32 %v1388_v52 }
 0x63e   :  { %v2690_v53 = vpop.eup %2689 }
 0x63f   :  { %v2692_v29 = vpop.eup %2691  ;;  %v3411_v35 = vmul.f32 %v2690_v53, %v1365_v12 }
 0x640   :  { %v1389_v55 = vadd.f32 1.0, %v2692_v29 }
 0x641   :  { %1405 = vadd.xlane.f32.xlu1 %v3411_v35  ;;  %v1420_v57 = vmul.f32 %v3411_v35, %v3411_v35 }
 0x642   :  { %v2694_v56 = vpop.eup %2693  ;;  %2699 = vrcp.f32 %v1389_v55 }
 0x643   :  { %v3416_v38 = vmul.f32 %v2694_v56, %v1366_v18 }
 0x645   :  { %1425 = vadd.xlane.f32.xlu1 %v1420_v57  ;;  %1407 = vadd.xlane.f32.xlu0 %v3416_v38  ;;  %v1421_v41 = vmul.f32 %v3416_v38, %v3416_v38 }
 0x646   :  { %v2696_v58 = vpop.eup %2695 }
 0x647   :  { %v3421_v59 = vmul.f32 %v2696_v58, %v1367_v25  ;;  %v2204_v58 = vld [vmem:[%s3594_s18] ss:$0 sm:$0xff] }
 0x649   :  { %1427 = vadd.xlane.f32.xlu0 %v1421_v41  ;;  %1409 = vadd.xlane.f32.xlu1 %v3421_v59  ;;  %v1422_v61 = vmul.f32 %v3421_v59, %v3421_v59 }
 0x64a   :  { %v2698_v46 = vpop.eup %2697 }
 0x64b   :  { %v3426_v62 = vmul.f32 %v2698_v46, %v1368_v31 }
 0x64d   :  { %1429 = vadd.xlane.f32.xlu1 %v1422_v61  ;;  %1411 = vadd.xlane.f32.xlu0 %v3426_v62  ;;  %v1423_v1 = vmul.f32 %v3426_v62, %v3426_v62 }
 0x64f   :  { %v2700_v63 = vpop.eup %2699 }
 0x650   :  { %v3431_v2 = vmul.f32 %v2700_v63, %v1369_v40 }
 0x651   :  { %1431 = vadd.xlane.f32.xlu0 %v1423_v1  ;;  %v2205_v1 = vld [vmem:[%s3595_s19] ss:$0 sm:$0xff] }
 0x652   :  { %1413 = vadd.xlane.f32.xlu1 %v3431_v2  ;;  %v1424_v4 = vmul.f32 %v3431_v2, %v3431_v2 }
 0x655   :  { %1433 = vadd.xlane.f32.xlu0 %v1424_v4 }
 0x6ca   :  { %v1406_v11 = vpop.xlane.xlu1 %1405 }
 0x6cb   :  { %v1415_v12 = vmul.f32 0.0078125, %v1406_v11 }
 0x6cd   :  { %v1440_v16 = vmul.f32 %v1415_v12, %v1415_v12  ;;  %v1450_v53 = vsub.f32 %v3411_v35, %v1415_v12 }
 0x6ce   :  { %v1426_v13 = vpop.xlane.xlu1 %1425  ;;  %v1408_v14 = vpop.xlane.xlu0 %1407 }
 0x6cf   :  { %v1435_v17 = vmul.f32 0.0078125, %v1426_v13  ;;  %v1416_v18 = vmul.f32 0.0078125, %v1408_v14 }
 0x6d1   :  { %v1445_v19 = vsub.f32 %v1435_v17, %v1440_v16  ;;  %v1441_v25 = vmul.f32 %v1416_v18, %v1416_v18  ;;  %v1451_v41 = vsub.f32 %v3416_v38, %v1416_v18 }
 0x6d2   :  { %v1410_v20 = vpop.xlane.xlu1 %1409  ;;  %v1428_v60 = vpop.xlane.xlu0 %1427 }
 0x6d3   :  { %v1455_v22 = vadd.f32 0.1, %v1445_v19  ;;  %v1417_v27 = vmul.f32 0.0078125, %v1410_v20  ;;  %v1436_v44 = vmul.f32 0.0078125, %v1428_v60  ;;  %v2206_v20 = vld [vmem:[%s3587_s11] ss:$0 sm:$0xff] }
 0x6d5   :  { %2701 = vrsqrt.f32 %v1455_v22  ;;  %v1446_v28 = vsub.f32 %v1436_v44, %v1441_v25  ;;  %v1442_v37 = vmul.f32 %v1417_v27, %v1417_v27  ;;  %v1452_v35 = vsub.f32 %v3421_v59, %v1417_v27 }
 0x6d6   :  { %v1430_v24 = vpop.xlane.xlu1 %1429  ;;  %v1412_v31 = vpop.xlane.xlu0 %1411 }
 0x6d7   :  { %v1456_v26 = vadd.f32 0.1, %v1446_v28  ;;  %v1437_v47 = vmul.f32 0.0078125, %v1430_v24  ;;  %v1418_v39 = vmul.f32 0.0078125, %v1412_v31 }
 0x6d9   :  { %2703 = vrsqrt.f32 %v1456_v26  ;;  %v1447_v40 = vsub.f32 %v1437_v47, %v1442_v37  ;;  %v1443_v45 = vmul.f32 %v1418_v39, %v1418_v39  ;;  %v1453_v7 = vsub.f32 %v3426_v62, %v1418_v39 }
 0x6da   :  { %v1432_v23 = vpop.xlane.xlu0 %1431 }
 0x6db   :  { %v1457_v42 = vadd.f32 0.1, %v1447_v40  ;;  %v1414_v34 = vpop.xlane.xlu1 %1413  ;;  %v1438_v32 = vmul.f32 0.0078125, %v1432_v23 }
 0x6dc   :  { %v1419_v36 = vmul.f32 0.0078125, %v1414_v34 }
 0x6dd   :  { %2705 = vrsqrt.f32 %v1457_v42  ;;  %v1448_v48 = vsub.f32 %v1438_v32, %v1443_v45 }
 0x6de   :  { %v1434_v30 = vpop.xlane.xlu0 %1433  ;;  %v1444_v50 = vmul.f32 %v1419_v36, %v1419_v36  ;;  %v1454_v11 = vsub.f32 %v3431_v2, %v1419_v36 }
 0x6df   :  { %v1458_v43 = vadd.f32 0.1, %v1448_v48  ;;  %v1439_v52 = vmul.f32 0.0078125, %v1434_v30 }
 0x6e1   :  { %2707 = vrsqrt.f32 %v1458_v43  ;;  %v1449_v29 = vsub.f32 %v1439_v52, %v1444_v50 }
 0x6e2   :  { %v2702_v55 = vpop.eup %2701 }
 0x6e3   :  { %v1465_v56 = vmul.f32 %v2702_v55, %v1450_v53  ;;  %v1459_v57 = vadd.f32 0.1, %v1449_v29 }
 0x6e5   :  { %2709 = vrsqrt.f32 %v1459_v57  ;;  %v1477_v63 = vmul.f32 %v2204_v58, %v1465_v56 }
 0x6e6   :  { %v2704_v46 = vpop.eup %2703 }
 0x6e7   :  { %v1466_v61 = vmul.f32 %v2704_v46, %v1451_v41  ;;  %v1489_v5 = vadd.f32 %v2205_v1, %v1477_v63 }
 0x6e9   :  { %v1478_v49 = vmul.f32 %v2204_v58, %v1466_v61  ;;  %v1494_v2 = vadd.f32 %v1489_v5, %v3392_v54 }
 0x6ea   :  { %v2706_v4 = vpop.eup %2705 }
 0x6eb   :  { %v1490_v6 = vadd.f32 %v2205_v1, %v1478_v49  ;;  %v1467_v51 = vmul.f32 %v2706_v4, %v1452_v35 }
 0x6ed   :  { %v1499_v8 = vpack.c.bf16 %v1490_v6, %v1489_v5  ;;  %v1479_v10 = vmul.f32 %v2204_v58, %v1467_v51  ;;  %v1495_v24 = vadd.f32 %v1490_v6, %v3396_v15 }
 0x6ee   :  { %v2708_v33 = vpop.eup %2707 }
 0x6ef   :  { %2456 = vmatmul.mubr.bf16.vlgmr.msra.gmra.mxu1 %v1499_v8  ;;  %v1468_v38 = vmul.f32 %v2708_v33, %v1453_v7  ;;  %v1491_v59 = vadd.f32 %v2205_v1, %v1479_v10 }
 0x6f0   :  { %2459 = vmatprep.mubr.msk.bf16.mxu1 %vm2998_vm0, %v2997_v0 }
 0x6f1   :  { %v1480_v12 = vmul.f32 %v2204_v58, %v1468_v38  ;;  %v1496_v39 = vadd.f32 %v1491_v59, %v3400_v21 }
 0x6f2   :  { %v2710_v13 = vpop.eup %2709 }
 0x6f3   :  { %v1492_v14 = vadd.f32 %v2205_v1, %v1480_v12  ;;  %v1469_v16 = vmul.f32 %v2710_v13, %v1454_v11 }
 0x6f5   :  { %v1500_v17 = vpack.c.bf16 %v1492_v14, %v1491_v59  ;;  %v1481_v18 = vmul.f32 %v2204_v58, %v1469_v16  ;;  %v1497_v34 = vadd.f32 %v1492_v14, %v3404_v3  ;;  %v2559_v59 = vld [vmem:[#allocation14 + $0x74] ss:$8 sps:$4 sm:$0xff]   ;;  %v2557_v16 = vld [vmem:[#allocation14 + $0x70] ss:$8 sps:$4 sm:$0xff]  }
 0x6f6   :  { %2467 = vmatprep.subr.bf16.mxu1 %v2559_v59  ;;  %1869 = vmatprep.subr.bf16.mxu0 %v2559_v59 }
 0x6f7   :  { %2460 = vmatmul.mubr.bf16.gmra.mxu1 %v1500_v17  ;;  %v1493_v62 = vadd.f32 %v2205_v1, %v1481_v18  ;;  %v2562_v17 = vld [vmem:[#allocation14 + $0x64] ss:$8 sps:$4 sm:$0xff]   ;;  %1870 = vmatpush1.bf16.msra.mxu0 %v2557_v16  ;;  %v2560_v18 = vld [vmem:[#allocation14 + $0x60] ss:$8 sps:$4 sm:$0xff]  }
 0x6f8   :  { %2463 = vmatprep.mubr.msk.bf16.mxu1 %vm2998_vm0, %v2997_v0  ;;  %2475 = vmatpush1.bf16.msra.mxu1 %v2557_v16 }
 0x6f9   :  { %v1501_v19 = vpack.c.bf16 %v1493_v62, %v1493_v62  ;;  %v1498_v50 = vadd.f32 %v1493_v62, %v3408_v9  ;;  %2468 = vmatprep.subr.bf16.mxu1 %v2562_v17  ;;  %1871 = vmatprep.subr.bf16.mxu0 %v2562_v17  ;;  %v2565_v62 = vld [vmem:[#allocation14 + $0x54] ss:$8 sps:$4 sm:$0xff]  }
 0x6fb   :  { %1872 = vmatpush1.bf16.msra.mxu0 %v2560_v18 }
 0x6fc   :  { %2476 = vmatpush1.bf16.msra.mxu1 %v2560_v18  ;;  %1873 = vmatprep.subr.bf16.mxu0 %v2565_v62 }
 0x6fd   :  { %2469 = vmatprep.subr.bf16.mxu1 %v2565_v62 }
 0x6ff   :  { %2464 = vmatmul.mubr.bf16.gmra.mxu1 %v1501_v19  ;;  %v2563_v19 = vld [vmem:[#allocation14 + $0x50] ss:$8 sps:$4 sm:$0xff]  }
 0x700   :  { %2477 = vmatpush1.bf16.msra.mxu1 %v2563_v19  ;;  %1874 = vmatpush1.bf16.msra.mxu0 %v2563_v19 }
 0x7af   :  { %v1607_v60 = vpop.f32.mrf.mxu1 }
 0x7b0   :  { %v1608_v22 = vadd.f32 %v2206_v20, %v1607_v60  ;;  %v2566_v60 = vld [vmem:[#allocation14 + $0x40] ss:$8 sps:$4 sm:$0xff]  }
 0x7b1   :  { %v2457_v25 = vpop.f32.mrf.mxu1 }
 0x7b2   :  { %v1629_v27 = vadd.f32 %v1608_v22, %v1494_v2  ;;  %v2571_v2 = vld [vmem:[#allocation14 + $0x34] ss:$8 sps:$4 sm:$0xff]   ;;  %v2569_v22 = vld [vmem:[#allocation14 + $0x30] ss:$8 sps:$4 sm:$0xff]   ;;  %v2574_v25 = vld [vmem:[#allocation14 + $0x24] ss:$8 sps:$4 sm:$0xff]  }
 0x7b3   :  { %v1610_v44 = vpop.f32.mrf.mxu1 }
 0x7b4   :  { %v2215_v28 = vmul.f32 -1.442695, %v1629_v27  ;;  %v1611_v31 = vadd.f32 %v2206_v20, %v1610_v44  ;;  %v2577_v44 = vld [vmem:[#allocation14 + $0x14] ss:$8 sps:$4 sm:$0xff]  }
 0x7b5   :  { %v2458_v37 = vpop.f32.mrf.mxu1 }
 0x7b6   :  { %2711 = vpow2.f32 %v2215_v28  ;;  %v1630_v0 = vadd.f32 %v1611_v31, %v1495_v24  ;;  %v2575_v28 = vld [vmem:[#allocation14 + $0x10] ss:$8 sps:$4 sm:$0xff]   ;;  %v2580_v24 = vld [vmem:[#allocation14 + $0x4] ss:$8 sps:$4 sm:$0xff]   ;;  %v2578_v31 = vld [vmem:[#allocation14] ss:$8 sps:$4 sm:$0xff]  }
 0x7b7   :  { %v1615_v26 = vpop.f32.mrf.mxu1  ;;  %v2999_v37 = vmov 0  }
 0x7b8   :  { %v2216_v47 = vmul.f32 -1.442695, %v1630_v0  ;;  %v1616_v40 = vadd.f32 %v2206_v20, %v1615_v26  ;;  %1911 = vmatprep.mubr.bf16.mxu1 %v2999_v37  ;;  %1901 = vmatprep.mubr.bf16.mxu0 %v2999_v37 }
 0x7b9   :  { %v2461_v23 = vpop.f32.mrf.mxu1 }
 0x7ba   :  { %2713 = vpow2.f32 %v2216_v47  ;;  %v1631_v42 = vadd.f32 %v1616_v40, %v1496_v39 }
 0x7bb   :  { %v1618_v54 = vpop.f32.mrf.mxu1 }
 0x7bc   :  { %v2217_v45 = vmul.f32 -1.442695, %v1631_v42  ;;  %v1619_v32 = vadd.f32 %v2206_v20, %v1618_v54 }
 0x7bd   :  { %v2462_v36 = vpop.f32.mrf.mxu1 }
 0x7be   :  { %2715 = vpow2.f32 %v2217_v45  ;;  %v1632_v15 = vadd.f32 %v1619_v32, %v1497_v34 }
 0x7bf   :  { %v1623_v48 = vpop.f32.mrf.mxu1 }
 0x7c0   :  { %v2218_v30 = vmul.f32 -1.442695, %v1632_v15  ;;  %v1624_v43 = vadd.f32 %v2206_v20, %v1623_v48  ;;  %v2568_v20 = vld [vmem:[#allocation14 + $0x44] ss:$8 sps:$4 sm:$0xff]  }
 0x7c1   :  { %v2465_v52 = vpop.f32.mrf.mxu1  ;;  %2470 = vmatprep.subr.bf16.mxu1 %v2568_v20  ;;  %1875 = vmatprep.subr.bf16.mxu0 %v2568_v20 }
 0x7c2   :  { %2717 = vpow2.f32 %v2218_v30  ;;  %v1633_v21 = vadd.f32 %v1624_v43, %v1498_v50  ;;  %2478 = vmatpush1.bf16.msra.mxu1 %v2566_v60  ;;  %1876 = vmatpush1.bf16.msra.mxu0 %v2566_v60 }
 0x7c3   :  { %v2712_v53 = vpop.eup %2711  ;;  %v1626_v29 = vpop.f32.mrf.mxu1  ;;  %2471 = vmatprep.subr.bf16.mxu1 %v2571_v2  ;;  %1877 = vmatprep.subr.bf16.mxu0 %v2571_v2 }
 0x7c4   :  { %v1649_v55 = vadd.f32 1.0, %v2712_v53  ;;  %v2219_v56 = vmul.f32 -1.442695, %v1633_v21 }
 0x7c5   :  { %v2466_v57 = vpop.f32.mrf.mxu1 }
 0x7c6   :  { %2719 = vrcp.f32 %v1649_v55  ;;  %2479 = vmatpush1.bf16.msra.mxu1 %v2569_v22  ;;  %1878 = vmatpush1.bf16.msra.mxu0 %v2569_v22 }
 0x7c7   :  { %v2714_v58 = vpop.eup %2713  ;;  %2721 = vpow2.f32 %v2219_v56  ;;  %2472 = vmatprep.subr.bf16.mxu1 %v2574_v25  ;;  %1879 = vmatprep.subr.bf16.mxu0 %v2574_v25 }
 0x7c8   :  { %v1650_v3 = vadd.f32 1.0, %v2714_v58 }
 0x7ca   :  { %2723 = vrcp.f32 %v1650_v3 }
 0x7cb   :  { %v2716_v41 = vpop.eup %2715 }
 0x7cc   :  { %v1651_v46 = vadd.f32 1.0, %v2716_v41 }
 0x7ce   :  { %2725 = vrcp.f32 %v1651_v46 }
 0x7cf   :  { %v2718_v61 = vpop.eup %2717 }
 0x7d0   :  { %v1652_v63 = vadd.f32 1.0, %v2718_v61 }
 0x7d2   :  { %2727 = vrcp.f32 %v1652_v63 }
 0x7d3   :  { %v2720_v9 = vpop.eup %2719 }
 0x7d4   :  { %v2722_v1 = vpop.eup %2721  ;;  %v3466_v35 = vmul.f32 %v2720_v9, %v1629_v27  ;;  %v2572_v27 = vld [vmem:[#allocation14 + $0x20] ss:$8 sps:$4 sm:$0xff]  }
 0x7d5   :  { %v1653_v49 = vadd.f32 1.0, %v2722_v1  ;;  %2480 = vmatpush1.bf16.msra.mxu1 %v2572_v27  ;;  %1880 = vmatpush1.bf16.msra.mxu0 %v2572_v27 }
 0x7d6   :  { %1669 = vadd.xlane.f32.xlu1 %v3466_v35  ;;  %v1684_v38 = vmul.f32 %v3466_v35, %v3466_v35  ;;  %2473 = vmatprep.subr.bf16.mxu1 %v2577_v44 }
 0x7d7   :  { %v2724_v4 = vpop.eup %2723  ;;  %2729 = vrcp.f32 %v1653_v49  ;;  %1881 = vmatprep.subr.bf16.mxu0 %v2577_v44 }
 0x7d8   :  { %v3469_v5 = vmul.f32 %v2724_v4, %v1630_v0 }
 0x7d9   :  { %2481 = vmatpush1.bf16.msra.mxu1 %v2575_v28  ;;  %1882 = vmatpush1.bf16.msra.mxu0 %v2575_v28 }
 0x7da   :  { %1671 = vadd.xlane.f32.xlu0 %v3469_v5  ;;  %v1685_v12 = vmul.f32 %v3469_v5, %v3469_v5  ;;  %2474 = vmatprep.subr.bf16.mxu1 %v2580_v24 }
 0x7db   :  { %v2726_v6 = vpop.eup %2725  ;;  %1883 = vmatprep.subr.bf16.mxu0 %v2580_v24 }
 0x7dc   :  { %v3472_v51 = vmul.f32 %v2726_v6, %v1631_v42 }
 0x7dd   :  { %2482 = vmatpush1.bf16.msra.mxu1 %v2578_v31  ;;  %1884 = vmatpush1.bf16.msra.mxu0 %v2578_v31 }
 0x7de   :  { %1673 = vadd.xlane.f32.xlu1 %v3472_v51  ;;  %v1686_v8 = vmul.f32 %v3472_v51, %v3472_v51 }
 0x7df   :  { %v2728_v7 = vpop.eup %2727 }
 0x7e0   :  { %v3477_v33 = vmul.f32 %v2728_v7, %v1632_v15 }
 0x7e2   :  { %1693 = vadd.xlane.f32.xlu1 %v1686_v8  ;;  %1675 = vadd.xlane.f32.xlu0 %v3477_v33  ;;  %v1687_v10 = vmul.f32 %v3477_v33, %v3477_v33 }
 0x7e4   :  { %v2730_v11 = vpop.eup %2729 }
 0x7e5   :  { %v3486_v13 = vmul.f32 %v2730_v11, %v1633_v21  ;;  %v2220_v11 = vld [vmem:[%s3596_s20] ss:$0 sm:$0xff] }
 0x7e6   :  { %1689 = vadd.xlane.f32.xlu1 %v1684_v38  ;;  %1695 = vadd.xlane.f32.xlu0 %v1687_v10 }
 0x7e7   :  { %v1688_v14 = vmul.f32 %v3486_v13, %v3486_v13 }
 0x7ea   :  { %1691 = vadd.xlane.f32.xlu0 %v1685_v12  ;;  %1677 = vadd.xlane.f32.xlu1 %v3486_v13 }
 0x7ee   :  { %1697 = vadd.xlane.f32.xlu0 %v1688_v14 }
 0x85f   :  { %v1670_v0 = vpop.xlane.xlu1 %1669 }
 0x860   :  { %v1679_v40 = vmul.f32 0.0078125, %v1670_v0 }
 0x862   :  { %v1704_v36 = vmul.f32 %v1679_v40, %v1679_v40  ;;  %v1714_v10 = vsub.f32 %v3466_v35, %v1679_v40 }
 0x863   :  { %v1672_v26 = vpop.xlane.xlu0 %1671 }
 0x864   :  { %v1680_v15 = vmul.f32 0.0078125, %v1672_v26 }
 0x866   :  { %v1705_v55 = vmul.f32 %v1680_v15, %v1680_v15  ;;  %v1715_v62 = vsub.f32 %v3469_v5, %v1680_v15 }
 0x867   :  { %v1674_v47 = vpop.xlane.xlu1 %1673 }
 0x868   :  { %v1681_v39 = vmul.f32 0.0078125, %v1674_v47 }
 0x86a   :  { %v1706_v54 = vmul.f32 %v1681_v39, %v1681_v39  ;;  %v1716_v8 = vsub.f32 %v3472_v51, %v1681_v39  ;;  %v2221_v51 = vld [vmem:[%s3597_s21] ss:$0 sm:$0xff]  ;;  %v1779_v39 = vlaneseq }
 0x86b   :  { %v1694_v23 = vpop.xlane.xlu1 %1693  ;;  %v1676_v42 = vpop.xlane.xlu0 %1675 }
 0x86c   :  { %v1701_v45 = vmul.f32 0.0078125, %v1694_v23  ;;  %v1682_v34 = vmul.f32 0.0078125, %v1676_v42  ;;  %v1780_v40 = vshrl.u32 %v1779_v39, 7 }
 0x86e   :  { %v1711_v32 = vsub.f32 %v1701_v45, %v1706_v54  ;;  %v1707_v43 = vmul.f32 %v1682_v34, %v1682_v34  ;;  %v1717_v59 = vsub.f32 %v3477_v33, %v1682_v34  ;;  %v1785_v23 = vsub.s32 1, %v1780_v40 }
 0x86f   :  { %v1690_v48 = vpop.xlane.xlu1 %1689  ;;  %v1696_v30 = vpop.xlane.xlu0 %1695  ;;  %v1781_v15 = vsub.s32 0, %v1780_v40 }
 0x870   :  { %v1721_v50 = vadd.f32 0.1, %v1711_v32  ;;  %v1699_v52 = vmul.f32 0.0078125, %v1690_v48  ;;  %v1702_v21 = vmul.f32 0.0078125, %v1696_v30 }
 0x872   :  { %2731 = vrsqrt.f32 %v1721_v50  ;;  %v1709_v53 = vsub.f32 %v1699_v52, %v1704_v36  ;;  %v1712_v29 = vsub.f32 %v1702_v21, %v1707_v43 }
 0x873   :  { %v1678_v56 = vpop.xlane.xlu1 %1677  ;;  %v1692_v57 = vpop.xlane.xlu0 %1691 }
 0x874   :  { %v1719_v58 = vadd.f32 0.1, %v1709_v53  ;;  %v1722_v3 = vadd.f32 0.1, %v1712_v29  ;;  %v1683_v41 = vmul.f32 0.0078125, %v1678_v56  ;;  %v1700_v46 = vmul.f32 0.0078125, %v1692_v57 }
 0x876   :  { %2733 = vrsqrt.f32 %v1719_v58  ;;  %v1710_v61 = vsub.f32 %v1700_v46, %v1705_v55  ;;  %v1708_v9 = vmul.f32 %v1683_v41, %v1683_v41  ;;  %v1718_v25 = vsub.f32 %v3486_v13, %v1683_v41  ;;  %v1777_v13 = vld [vmem:[%s3599_s23] sm:$0x3]  ;;  %v203_v58 = vld [vmem:[#allocation5] sm:$0xff]  ;;  %s3000_s23 = smov [#allocation16]  }
 0x877   :  { %2735 = vrsqrt.f32 %v1722_v3  ;;  %v1698_v63 = vpop.xlane.xlu0 %1697  ;;  %v1786_v42 = vrot.slane %v1777_v13, %v1785_v23  ;;  %v1782_v57 = vrot.slane %v1777_v13, %v1781_v15  ;;  %s2110_s12 = sshll.u32 %s3000_s23, 4  ;;  %s2111_s12 = int_to_ptr.vmem [resolvable:$true] %s2110_s12 }
 0x878   :  { %v1720_v1 = vadd.f32 0.1, %v1710_v61  ;;  %v1703_v49 = vmul.f32 0.0078125, %v1698_v63  ;;  %v1930_v61 = vmul.f32 %v203_v58, %v203_v58  ;;  %s2951_s13 = scalar_lea.vmem %s2111_s12, 640  ;;  %p2956_p13 = scmp.lt.s32.totalorder %s2111_s12, %s2111_s12 }
 0x879   :  { %p2952_p12 = scmp.ne.s32.totalorder %s2111_s12, %s2951_s13  ;;  %p2957_p0 = scmp.lt.s32.totalorder %s2951_s13, %s2951_s13 }
 0x87a   :  { %2737 = vrsqrt.f32 %v1720_v1  ;;  %v1713_v4 = vsub.f32 %v1703_v49, %v1708_v9  ;;  %v206_v49 = vld [vmem:[#allocation5 + $0x18] sm:$0xff] }
 0x87b   :  { %p2958_p1 = por %p2957_p0, %p2956_p13 }
 0x87c   :  { %v1723_v6 = vadd.f32 0.1, %v1713_v4 }
 0x87d   :  { %p2959_p2 = pnand %p2958_p1, %p2952_p12 }
 0x87e   :  { %2739 = vrsqrt.f32 %v1723_v6 }
 0x87f   :  { %v2732_v7 = vpop.eup %2731 }
 0x880   :  { %v1731_v38 = vmul.f32 %v2732_v7, %v1716_v8  ;;  %v1933_v7 = vmul.f32 %v206_v49, %v206_v49 }
 0x882   :  { %v1743_v18 = vmul.f32 %v2220_v11, %v1731_v38 }
 0x883   :  { %v2734_v12 = vpop.eup %2733 }
 0x884   :  { %v2736_v14 = vpop.eup %2735  ;;  %v1729_v16 = vmul.f32 %v2734_v12, %v1714_v10  ;;  %v1755_v2 = vadd.f32 %v2221_v51, %v1743_v18 }
 0x885   :  { %v1732_v17 = vmul.f32 %v2736_v14, %v1717_v59  ;;  %v1935_v14 = vadd.f32 1.837877, %v1930_v61 }
 0x886   :  { %v1741_v60 = vmul.f32 %v2220_v11, %v1729_v16 }
 0x887   :  { %v2738_v19 = vpop.eup %2737  ;;  %v1744_v20 = vmul.f32 %v2220_v11, %v1732_v17  ;;  %v1950_v17 = vmul.f32 4.539993e-05, %v1930_v61 }
 0x888   :  { %v1730_v35 = vmul.f32 %v2738_v19, %v1715_v62  ;;  %v1753_v28 = vadd.f32 %v2221_v51, %v1741_v60  ;;  %v1953_v19 = vmul.f32 4.539993e-05, %v1933_v7 }
 0x889   :  { %v1756_v22 = vadd.f32 %v2221_v51, %v1744_v20 }
 0x88a   :  { %v1742_v27 = vmul.f32 %v2220_v11, %v1730_v35 }
 0x88b   :  { %v2740_v33 = vpop.eup %2739  ;;  %v1759_v44 = vpack.c.bf16 %v1756_v22, %v1755_v2  ;;  %v1938_v22 = vadd.f32 1.837877, %v1933_v7 }
 0x88c   :  { %v1754_v24 = vadd.f32 %v2221_v51, %v1742_v27  ;;  %v1733_v31 = vmul.f32 %v2740_v33, %v1718_v25  ;;  %v1940_v25 = vmul.f32 -0.5, %v1935_v14  ;;  %v1955_v27 = vadd.f32 11.837877, %v1950_v17  ;;  %v204_v33 = vld [vmem:[#allocation5 + $0x8] sm:$0xff] }
 0x88d   :  { %1912 = vmatmul.mubr.bf16.vlgmr.msra.gmra.mxu1 %v1759_v44  ;;  %v1943_v13 = vmul.f32 -0.5, %v1938_v22 }
 0x88e   :  { %v1758_v5 = vpack.c.bf16 %v1754_v24, %v1753_v28  ;;  %1921 = vmatprep.mubr.bf16.mxu1 %v2999_v37  ;;  %v1745_v0 = vmul.f32 %v2220_v11, %v1733_v31  ;;  %v205_v37 = vld [vmem:[#allocation5 + $0x10] sm:$0xff]  ;;  %v1958_v28 = vadd.f32 11.837877, %v1953_v19  ;;  %v1931_v24 = vmul.f32 %v204_v33, %v204_v33  ;;  %v207_v31 = vld [vmem:[#allocation5 + $0x20] sm:$0xff] }
 0x88f   :  { %v1932_v50 = vmul.f32 %v205_v37, %v205_v37 }
 0x890   :  { %1902 = vmatmul.mubr.bf16.vlgmr.msra.gmra.mxu0 %v1758_v5  ;;  %v1757_v26 = vadd.f32 %v2221_v51, %v1745_v0  ;;  %v1963_v15 = vmul.f32 -0.5, %v1958_v28 }
 0x891   :  { %v1952_v46 = vmul.f32 4.539993e-05, %v1932_v50  ;;  %v1937_v12 = vadd.f32 1.837877, %v1932_v50 }
 0x892   :  { %v1760_v47 = vpack.c.bf16 %v1757_v26, %v1757_v26 }
 0x893   :  { %v1957_v59 = vadd.f32 11.837877, %v1952_v46  ;;  %v1942_v60 = vmul.f32 -0.5, %v1937_v12  ;;  %v1948_v46 = vadd.f32 -1.89712, %v1943_v13 }
 0x895   :  { %1922 = vmatmul.mubr.bf16.gmra.mxu1 %v1760_v47  ;;  %v1962_v2 = vmul.f32 -0.5, %v1957_v59  ;;  %v1934_v47 = vmul.f32 %v207_v31, %v207_v31  ;;  %v3523_v40 = vadd.f32 -1.89712, %v1942_v60 }
 0x897   :  { %v3525_v23 = vadd.f32 -2.3025851, %v1962_v2 }
 0x94d   :  { %v1913_v54 = vpop.f32.mrf.mxu1 }
 0x94e   :  { %v1914_v38 = vadd.f32 %v1913_v54, %v1782_v57 }
 0x94f   :  { %v1915_v45 = vpop.f32.mrf.mxu1 }
 0x950   :  { %v3508_v34 = vadd.f32 %v1915_v45, %v1786_v42  ;;  %v1903_v32 = vpop.f32.mrf.mxu0  ;;  %v1972_v20 = vsub.f32 %v205_v37, %v1914_v38 }
 0x951   :  { %v1917_v36 = vpop.f32.mrf.mxu1  ;;  %v1904_v51 = vadd.f32 %v1903_v32, %v1782_v57  ;;  %v3528_v32 = vadd.f32 -1.89712, %v1940_v25 }
 0x952   :  { %v1987_v48 = vsub.f32 0.0, %v3508_v34  ;;  %v1905_v30 = vpop.f32.mrf.mxu0  ;;  %v1918_v35 = vadd.f32 %v1917_v36, %v1782_v57  ;;  %v1982_v5 = vmul.f32 %v1972_v20, %v1972_v20  ;;  %v1977_v54 = vadd.f32 1.837877, %v3508_v34 }
 0x953   :  { %v3511_v43 = vadd.f32 %v1905_v30, %v1786_v42  ;;  %v1919_v52 = vpop.f32.mrf.mxu1  ;;  %v1970_v44 = vsub.f32 %v203_v58, %v1904_v51  ;;  %v1960_v36 = vmul.f32 -0.5, %v1955_v27  ;;  %v1951_v30 = vmul.f32 4.539993e-05, %v1931_v24 }
 0x954   :  { %v1994_v21 = vmul.f32 1.442695, %v1987_v48  ;;  %v3513_v53 = vadd.f32 %v1919_v52, %v1786_v42  ;;  %v1907_v29 = vpop.f32.mrf.mxu0  ;;  %v1973_v0 = vsub.f32 %v206_v49, %v1918_v35  ;;  %v1936_v48 = vadd.f32 1.837877, %v1931_v24 }
 0x955   :  { %v1985_v55 = vsub.f32 0.0, %v3511_v43  ;;  %v1923_v56 = vpop.f32.mrf.mxu1  ;;  %v1908_v26 = vadd.f32 %v1907_v29, %v1782_v57  ;;  %v1980_v37 = vmul.f32 %v1970_v44, %v1970_v44  ;;  %v1968_v49 = vadd.f32 -2.3025851, %v1963_v15 }
 0x956   :  { %2741 = vpow2.f32 %v1994_v21  ;;  %v1988_v3 = vsub.f32 0.0, %v3513_v53  ;;  %v1909_v41 = vpop.f32.mrf.mxu0  ;;  %v1983_v21 = vmul.f32 %v1973_v0, %v1973_v0  ;;  %v1978_v61 = vadd.f32 1.837877, %v3513_v53 }
 0x957   :  { %v1990_v63 = vmul.f32 1.442695, %v1985_v55  ;;  %v3517_v9 = vadd.f32 %v1909_v41, %v1786_v42  ;;  %v1925_v1 = vpop.f32.mrf.mxu1  ;;  %v1971_v29 = vsub.f32 %v204_v33, %v1908_v26  ;;  %v1939_v55 = vadd.f32 1.837877, %v1934_v47 }
 0x958   :  { %v1996_v4 = vmul.f32 1.442695, %v1988_v3  ;;  %v3519_v6 = vadd.f32 %v1925_v1, %v1786_v42  ;;  %v1924_v42 = vadd.f32 %v1923_v56, %v1782_v57  ;;  %v1975_v3 = vadd.f32 1.837877, %v3511_v43 }
 0x959   :  { %2743 = vpow2.f32 %v1990_v63  ;;  %v1927_v8 = vpop.f32.mrf.mxu1  ;;  %v1986_v10 = vsub.f32 0.0, %v3517_v9  ;;  %v1954_v56 = vmul.f32 4.539993e-05, %v1934_v47  ;;  %v1965_v1 = vadd.f32 -2.3025851, %v1960_v36 }
 0x95a   :  { %2745 = vpow2.f32 %v1996_v4  ;;  %v1989_v11 = vsub.f32 0.0, %v3519_v6  ;;  %v1974_v57 = vsub.f32 %v207_v31, %v1924_v42  ;;  %v1956_v7 = vadd.f32 11.837877, %v1951_v30 }
 0x95b   :  { %v1928_v16 = vpop.f32.mrf.mxu1  ;;  %v1992_v18 = vmul.f32 1.442695, %v1986_v10  ;;  %v1941_v10 = vmul.f32 -0.5, %v1936_v48  ;;  %v1944_v14 = vmul.f32 -0.5, %v1939_v55  ;;  %v1959_v43 = vadd.f32 11.837877, %v1954_v56 }
 0x95c   :  { %v1998_v62 = vmul.f32 1.442695, %v1989_v11  ;;  %v1981_v11 = vmul.f32 %v1971_v29, %v1971_v29  ;;  %v1984_v16 = vmul.f32 %v1974_v57, %v1974_v57  ;;  %v1976_v53 = vadd.f32 1.837877, %v3517_v9 }
 0x95d   :  { %2747 = vpow2.f32 %v1992_v18  ;;  %v1961_v20 = vmul.f32 -0.5, %v1956_v7  ;;  %v1979_v35 = vadd.f32 1.837877, %v3519_v6  ;;  %v1946_v25 = vadd.f32 -1.89712, %v1941_v10 }
 0x95e   :  { %2749 = vpow2.f32 %v1998_v62  ;;  %v1949_v44 = vadd.f32 -1.89712, %v1944_v14  ;;  %v1964_v28 = vmul.f32 -0.5, %v1959_v43 }
 0x95f   :  { %v1966_v26 = vadd.f32 -2.3025851, %v1961_v20 }
 0x963   :  { %v2742_v39 = vpop.eup %2741 }
 0x964   :  { %v2002_v45 = vmul.f32 %v2742_v39, %v1982_v5 }
 0x966   :  { %v2744_v50 = vpop.eup %2743  ;;  %v2007_v52 = vadd.f32 %v2002_v45, %v1977_v54 }
 0x967   :  { %v2746_v58 = vpop.eup %2745  ;;  %v2000_v41 = vmul.f32 %v2744_v50, %v1980_v37 }
 0x968   :  { %v2012_v34 = vmul.f32 -0.5, %v2007_v52  ;;  %v2003_v63 = vmul.f32 %v2746_v58, %v1983_v21 }
 0x969   :  { %v2005_v4 = vadd.f32 %v2000_v41, %v1975_v3  ;;  %v1969_v3 = vadd.f32 -2.3025851, %v1964_v28 }
 0x96a   :  { %v2017_v8 = vadd.f32 -0.2876821, %v2012_v34  ;;  %v2008_v38 = vadd.f32 %v2003_v63, %v1978_v61  ;;  %v2748_v12 = vpop.eup %2747 }
 0x96b   :  { %v2010_v59 = vmul.f32 -0.5, %v2005_v4  ;;  %v2750_v17 = vpop.eup %2749  ;;  %v2001_v51 = vmul.f32 %v2748_v12, %v1981_v11 }
 0x96c   :  { %v2022_v18 = vmax.f32 %v3523_v40, %v2017_v8  ;;  %v2013_v62 = vmul.f32 -0.5, %v2008_v38  ;;  %v2004_v60 = vmul.f32 %v2750_v17, %v1984_v16 }
 0x96d   :  { %v2015_v19 = vadd.f32 -0.2876821, %v2010_v59  ;;  %v2006_v27 = vadd.f32 %v2001_v51, %v1976_v53 }
 0x96e   :  { %v3536_v2 = vmax.f32 %v2022_v18, %v3525_v23  ;;  %v2018_v22 = vadd.f32 -0.2876821, %v2013_v62  ;;  %v2009_v24 = vadd.f32 %v2004_v60, %v1979_v35 }
 0x96f   :  { %v2020_v33 = vmax.f32 %v3528_v32, %v2015_v19  ;;  %v2011_v47 = vmul.f32 -0.5, %v2006_v27 }
 0x970   :  { %v2032_v9 = vsub.f32 %v3523_v40, %v3536_v2  ;;  %v2047_v31 = vsub.f32 %v2017_v8, %v3536_v2  ;;  %v2067_v6 = vsub.f32 %v3525_v23, %v3536_v2  ;;  %v2023_v5 = vmax.f32 %v1948_v46, %v2018_v22 }
 0x971   :  { %v3544_v0 = vmax.f32 %v2020_v33, %v1965_v1  ;;  %v2014_v39 = vmul.f32 -0.5, %v2009_v24  ;;  %v2016_v15 = vadd.f32 -0.2876821, %v2011_v47 }
 0x972   :  { %v2039_v13 = vmul.f32 1.442695, %v2032_v9  ;;  %v2054_v42 = vmul.f32 1.442695, %v2047_v31  ;;  %v2074_v54 = vmul.f32 1.442695, %v2067_v6  ;;  %v3546_v45 = vmax.f32 %v2023_v5, %v1968_v49 }
 0x973   :  { %v2030_v36 = vsub.f32 %v3528_v32, %v3544_v0  ;;  %v2045_v40 = vsub.f32 %v2015_v19, %v3544_v0  ;;  %v2065_v37 = vsub.f32 %v1965_v1, %v3544_v0  ;;  %v2021_v55 = vmax.f32 %v1946_v25, %v2016_v15 }
 0x974   :  { %2751 = vpow2.f32 %v2039_v13  ;;  %v2033_v23 = vsub.f32 %v1948_v46, %v3546_v45  ;;  %v2048_v48 = vsub.f32 %v2018_v22, %v3546_v45  ;;  %v2068_v30 = vsub.f32 %v1968_v49, %v3546_v45 }
 0x975   :  { %2753 = vpow2.f32 %v2054_v42  ;;  %v2035_v50 = vmul.f32 1.442695, %v2030_v36  ;;  %v2050_v52 = vmul.f32 1.442695, %v2045_v40  ;;  %v2070_v21 = vmul.f32 1.442695, %v2065_v37 }
 0x976   :  { %2755 = vpow2.f32 %v2074_v54  ;;  %v2041_v29 = vmul.f32 1.442695, %v2033_v23  ;;  %v2056_v32 = vmul.f32 1.442695, %v2048_v48  ;;  %v2019_v58 = vadd.f32 -0.2876821, %v2014_v39 }
 0x977   :  { %2757 = vpow2.f32 %v2035_v50  ;;  %v2076_v41 = vmul.f32 1.442695, %v2068_v30  ;;  %v3555_v56 = vmax.f32 %v2021_v55, %v1966_v26 }
 0x978   :  { %2759 = vpow2.f32 %v2050_v52  ;;  %v2024_v57 = vmax.f32 %v1949_v44, %v2019_v58 }
 0x979   :  { %2761 = vpow2.f32 %v2070_v21  ;;  %v2031_v34 = vsub.f32 %v1946_v25, %v3555_v56  ;;  %v2046_v46 = vsub.f32 %v2016_v15, %v3555_v56  ;;  %v2066_v61 = vsub.f32 %v1966_v26, %v3555_v56 }
 0x97a   :  { %2763 = vpow2.f32 %v2041_v29  ;;  %v3560_v63 = vmax.f32 %v2024_v57, %v1969_v3 }
 0x97b   :  { %2765 = vpow2.f32 %v2056_v32  ;;  %v2037_v1 = vmul.f32 1.442695, %v2031_v34  ;;  %v2052_v49 = vmul.f32 1.442695, %v2046_v46  ;;  %v2072_v4 = vmul.f32 1.442695, %v2066_v61 }
 0x97c   :  { %2767 = vpow2.f32 %v2076_v41  ;;  %v2034_v7 = vsub.f32 %v1949_v44, %v3560_v63  ;;  %v2049_v8 = vsub.f32 %v2019_v58, %v3560_v63  ;;  %v2069_v38 = vsub.f32 %v1969_v3, %v3560_v63 }
 0x97d   :  { %2769 = vpow2.f32 %v2037_v1 }
 0x97e   :  { %2771 = vpow2.f32 %v2052_v49  ;;  %v2043_v10 = vmul.f32 1.442695, %v2034_v7  ;;  %v2058_v11 = vmul.f32 1.442695, %v2049_v8  ;;  %v2078_v59 = vmul.f32 1.442695, %v2069_v38 }
 0x97f   :  { %2773 = vpow2.f32 %v2072_v4 }
 0x980   :  { %2775 = vpow2.f32 %v2043_v10 }
 0x981   :  { %v2752_v12 = vpop.eup %2751  ;;  %2777 = vpow2.f32 %v2058_v11 }
 0x982   :  { %v2754_v14 = vpop.eup %2753  ;;  %2779 = vpow2.f32 %v2078_v59 }
 0x983   :  { %v2756_v43 = vpop.eup %2755  ;;  %v2062_v16 = vadd.f32 %v2754_v14, %v2752_v12 }
 0x984   :  { %v2758_v17 = vpop.eup %2757 }
 0x985   :  { %v2760_v18 = vpop.eup %2759  ;;  %v2082_v62 = vadd.f32 %v2756_v43, %v2062_v16 }
 0x986   :  { %v2762_v53 = vpop.eup %2761  ;;  %v2060_v51 = vadd.f32 %v2760_v18, %v2758_v17 }
 0x987   :  { %v2764_v19 = vpop.eup %2763  ;;  %2781 = vlog2.f32 %v2082_v62 }
 0x988   :  { %v2766_v20 = vpop.eup %2765  ;;  %v2080_v35 = vadd.f32 %v2762_v53, %v2060_v51 }
 0x989   :  { %v2063_v60 = vadd.f32 %v2766_v20, %v2764_v19  ;;  %v2768_v22 = vpop.eup %2767 }
 0x98a   :  { %2783 = vlog2.f32 %v2080_v35  ;;  %v2770_v27 = vpop.eup %2769 }
 0x98b   :  { %v2083_v25 = vadd.f32 %v2768_v22, %v2063_v60  ;;  %v2772_v33 = vpop.eup %2771 }
 0x98c   :  { %v2774_v44 = vpop.eup %2773  ;;  %v2061_v28 = vadd.f32 %v2772_v33, %v2770_v27 }
 0x98d   :  { %2785 = vlog2.f32 %v2083_v25  ;;  %v2776_v24 = vpop.eup %2775 }
 0x98e   :  { %v2778_v9 = vpop.eup %2777  ;;  %v2081_v31 = vadd.f32 %v2774_v44, %v2061_v28 }
 0x98f   :  { %v2064_v6 = vadd.f32 %v2778_v9, %v2776_v24  ;;  %v2780_v5 = vpop.eup %2779 }
 0x990   :  { %2787 = vlog2.f32 %v2081_v31 }
 0x991   :  { %v2084_v26 = vadd.f32 %v2780_v5, %v2064_v6 }
 0x993   :  { %2789 = vlog2.f32 %v2084_v26 }
 0x994   :  { %v2782_v47 = vpop.eup %2781 }
 0x995   :  { %v2090_v39 = vmul.f32 0.6931472, %v2782_v47 }
 0x997   :  { %v2784_v13 = vpop.eup %2783  ;;  %v2097_v42 = vadd.f32 %v2090_v39, %v3536_v2 }
 0x998   :  { %v2086_v54 = vmul.f32 0.6931472, %v2784_v13 }
 0x999   :  { %2102 = vst [vmem:[#allocation16 + $0x10] sm:$0xff] %v2097_v42 }
 0x99a   :  { %v2786_v36 = vpop.eup %2785  ;;  %v2095_v40 = vadd.f32 %v2086_v54, %v3544_v0 }
 0x99b   :  { %v2092_v37 = vmul.f32 0.6931472, %v2786_v36 }
 0x99c   :  { %2100 = vst [vmem:[#allocation16] sm:$0xff] %v2095_v40 }
 0x99d   :  { %v2098_v15 = vadd.f32 %v2092_v37, %v3546_v45  ;;  %v2788_v23 = vpop.eup %2787 }
 0x99e   :  { %v2088_v48 = vmul.f32 0.6931472, %v2788_v23 }
 0x99f   :  { %2103 = vst [vmem:[#allocation16 + $0x18] sm:$0xff] %v2098_v15 }
 0x9a0   :  { %v2790_v30 = vpop.eup %2789  ;;  %v2096_v50 = vadd.f32 %v2088_v48, %v3555_v56 }
 0x9a1   :  { %v2094_v52 = vmul.f32 0.6931472, %v2790_v30 }
 0x9a2   :  { %2101 = vst [vmem:[#allocation16 + $0x8] sm:$0xff] %v2096_v50 }
 0x9a3   :  { %v2099_v2 = vadd.f32 %v2094_v52, %v3560_v63 }
 0x9a5   :  { %2104 = vst [vmem:[#allocation16 + $0x20] sm:$0xff] %v2099_v2 }
 0x9a6   :  { %2962 = shalt.err (!%p2959_p2)
}
 0x9a7   :  { %s3626_s29 = sld [smem:[#allocation32_spill]] }
 0x9ad   :  { %2116 = dma.vmem_to_hbm [thread:$0]  %s2111_s12, 640, %s3626_s29, [#allocation4], %s3622_s5, %s3622_s5, %s3621_s3  }
 0x9ae   :  { %2981 = dma.done.wait [#allocation4], 640  }
 0x9af   :  { %2982 = vsyncadd [#allocation4], 4294966656 }
 0x9b0   :  { %2120 = vsyncpa [#allocation3], 1 }
 0x9b1   :  { %2121 = vsyncpa [#allocation6], 1 }
 0x9b2   :  { %2122 = vsyncpa [#allocation9], 1 }
 0x9b3   :  { %2123 = vsyncpa [#allocation12], 1 }
 0x9b4   :  { %2124 = vsyncpa [#allocation15], 1 }
 0x9b5   :  { %2125 = vsyncpa [#allocation4], 1 }

</bundles_post_ra>
